<compile_context>
chip_gen: v7x
topology: tpu7x:2x2x1
jax: 0.10.0
libtpu: 0.0.40
codegen_flags: <defaults>
</compile_context>

<pallas_src>
import jax
import jax.numpy as jnp
from jax.experimental import pallas as pl
from jax.experimental.pallas import tpu as pltpu


def _round_up(x, m):
    return (x + m - 1) // m * m


def qnetwork_kernel(emb_ref, len_ref, wih_ref, whh_ref, bih_ref, bhh_ref,
                    wo_ref, bo_ref, out_ref):
    # emb_ref: [1, T*Bt, H]  bf16 (rows ordered t-major, batch-minor)
    # len_ref: [1, Bt, 1]    int32
    # wih/whh: [H, 3H] bf16  (gate slabs lane-aligned at offsets 0, H, 2H; H = 128k)
    # bih/bhh: [1, 3H] f32
    # wo:      [H, OUT] bf16 (logits || q fused), bo: [1, OUT] f32
    # out_ref: [Bt, OUT] f32
    H = emb_ref.shape[2]
    Bt = len_ref.shape[1]
    T = emb_ref.shape[1] // Bt

    whh = whh_ref[...]                                      # [H, 3H] bf16

    # Hoisted input projection: ONE MXU matmul over all T timesteps of this tile.
    gx_all = jnp.dot(emb_ref[0], wih_ref[...],
                     preferred_element_type=jnp.float32) + bih_ref[...]  # [T*Bt, 3H]

    # Hoisted broadcasts (JAX does not CSE broadcast_in_dim inside the loop).
    bhh = jnp.broadcast_to(bhh_ref[...], (Bt, 3 * H))       # [Bt, 3H] f32
    len_b = jnp.broadcast_to(len_ref[0], (Bt, H))           # [Bt, H] int32

    h = jnp.zeros((Bt, H), jnp.float32)
    for t in range(T):                                      # static unroll (T small)
        gx = gx_all[t * Bt:(t + 1) * Bt, :]                 # [Bt, 3H] static slice
        gh = jnp.dot(h.astype(jnp.bfloat16), whh,
                     preferred_element_type=jnp.float32) + bhh
        r = jax.nn.sigmoid(gx[:, :H] + gh[:, :H])           # EUP
        z = jax.nn.sigmoid(gx[:, H:2 * H] + gh[:, H:2 * H])
        n = jnp.tanh(gx[:, 2 * H:] + r * gh[:, 2 * H:])
        # Fold the length mask into the update gate: past the valid length,
        # z_eff == 1 so h is carried through unchanged (packed-seq semantics).
        z_eff = jnp.where(t < len_b, z, 1.0)                # [Bt, H]
        h = n + z_eff * (h - n)                             # == z*h + (1-z)*n

    # Fused heads: single lane-dense [Bt, OUT] store.
    out_ref[...] = (jnp.dot(h.astype(jnp.bfloat16), wo_ref[...],
                            preferred_element_type=jnp.float32)
                    + bo_ref[...]).astype(out_ref.dtype)


def qnetwork_forward(state, state_length, params):
    """state: [B, T] int32 item indices; state_length: [B] int32 valid lengths."""
    B, T = state.shape
    H = params["emb"].shape[1]
    item_num = params["w_q"].shape[0]

    H_pad = _round_up(H, 128)
    H3 = 3 * H_pad
    OUT = 2 * item_num
    OUT_pad = _round_up(OUT, 128)
    B_tile = min(128, _round_up(B, 8))
    B_pad = _round_up(B, B_tile)
    nbt = B_pad // B_tile

    f32, bf16 = jnp.float32, jnp.bfloat16

    # ---- weight prep (per-gate lane-aligned padding; bf16 for the MXU) ----
    def gate_pad_w(w):                                      # [3H, H] -> [H_pad, 3*H_pad]
        out = jnp.zeros((H_pad, H3), f32)
        wt = w.T.astype(f32)                                # [H, 3H]
        for g in range(3):
            out = out.at[:H, g * H_pad:g * H_pad + H].set(wt[:, g * H:(g + 1) * H])
        return out.astype(bf16)

    def gate_pad_b(b):                                      # [3H] -> [1, 3*H_pad]
        out = jnp.zeros((1, H3), f32)
        for g in range(3):
            out = out.at[0, g * H_pad:g * H_pad + H].set(b[g * H:(g + 1) * H])
        return out

    wih = gate_pad_w(params["w_ih"])
    whh = gate_pad_w(params["w_hh"])
    bih = gate_pad_b(params["b_ih"])
    bhh = gate_pad_b(params["b_hh"])

    wo = jnp.zeros((H_pad, OUT_pad), f32)
    wo = wo.at[:H, :item_num].set(params["w_logits"].T)
    wo = wo.at[:H, item_num:OUT].set(params["w_q"].T)
    wo = wo.astype(bf16)
    bo = jnp.zeros((1, OUT_pad), f32)
    bo = bo.at[0, :item_num].set(params["b_logits"])
    bo = bo.at[0, item_num:OUT].set(params["b_q"])

    emb_tab = jnp.zeros((params["emb"].shape[0], H_pad), f32)
    emb_tab = emb_tab.at[:, :H].set(params["emb"]).astype(bf16)

    # ---- activations: gather already in time-major, per-batch-tile 2-D layout ----
    # Only the tiny int32 index array is transposed; the gather writes the
    # embedding slab directly in the order the kernel consumes it.
    state_p = jnp.pad(state.astype(jnp.int32), ((0, B_pad - B), (0, 0)))
    idx = state_p.reshape(nbt, B_tile, T).transpose(0, 2, 1)       # [nbt, T, B_tile]
    emb_in = jnp.take(emb_tab, idx, axis=0).reshape(nbt, T * B_tile, H_pad)

    len_p = jnp.pad(state_length.astype(jnp.int32).reshape(B, 1),
                    ((0, B_pad - B), (0, 0))).reshape(nbt, B_tile, 1)

    out = pl.pallas_call(
        qnetwork_kernel,
        out_shape=jax.ShapeDtypeStruct((B_pad, OUT_pad), jnp.float32),
        grid_spec=pltpu.PrefetchScalarGridSpec(
            num_scalar_prefetch=0,
            grid=(nbt,),
            in_specs=[
                pl.BlockSpec((1, T * B_tile, H_pad), lambda b: (b, 0, 0)),  # emb
                pl.BlockSpec((1, B_tile, 1), lambda b: (b, 0, 0)),          # lengths
                pl.BlockSpec((H_pad, H3), lambda b: (0, 0)),                # w_ih
                pl.BlockSpec((H_pad, H3), lambda b: (0, 0)),                # w_hh
                pl.BlockSpec((1, H3), lambda b: (0, 0)),                    # b_ih
                pl.BlockSpec((1, H3), lambda b: (0, 0)),                    # b_hh
                pl.BlockSpec((H_pad, OUT_pad), lambda b: (0, 0)),           # w_head
                pl.BlockSpec((1, OUT_pad), lambda b: (0, 0)),               # b_head
            ],
            out_specs=pl.BlockSpec((B_tile, OUT_pad), lambda b: (b, 0)),
        ),
        compiler_params=pltpu.CompilerParams(
            dimension_semantics=("parallel",),
            vmem_limit_bytes=48 * 1024 * 1024),
    )(emb_in, len_p, wih, whh, bih, bhh, wo, bo)

    logits = out[:B, :item_num]
    q_values = out[:B, item_num:OUT]
    return logits, q_values


def init_params(key, item_num, hidden_size):
    ks = jax.random.split(key, 6)

    def xavier_normal(k, shape):
        fan_out, fan_in = shape
        std = (2.0 / (fan_in + fan_out)) ** 0.5
        return std * jax.random.normal(k, shape, dtype=jnp.float32)

    bound = 1.0 / (hidden_size ** 0.5)
    params = {
        # nn.Embedding(item_num + 1, hidden).weight ~ N(0, 0.01)
        "emb": 0.01 * jax.random.normal(ks[0], (item_num + 1, hidden_size),
                                        dtype=jnp.float32),
        # GRU weights (PyTorch default uniform(-1/sqrt(H), 1/sqrt(H))), gate order r,z,n
        "w_ih": jax.random.uniform(ks[1], (3 * hidden_size, hidden_size),
                                   minval=-bound, maxval=bound, dtype=jnp.float32),
        "w_hh": jax.random.uniform(ks[2], (3 * hidden_size, hidden_size),
                                   minval=-bound, maxval=bound, dtype=jnp.float32),
        "b_ih": jax.random.uniform(ks[3], (3 * hidden_size,),
                                   minval=-bound, maxval=bound, dtype=jnp.float32),
        "b_hh": jax.random.uniform(ks[4], (3 * hidden_size,),
                                   minval=-bound, maxval=bound, dtype=jnp.float32),
        # logits_layer / q_layer : xavier_normal weight, zero bias
        "w_logits": xavier_normal(jax.random.split(ks[5])[0],
                                  (item_num, hidden_size)),
        "b_logits": jnp.zeros((item_num,), jnp.float32),
        "w_q": xavier_normal(jax.random.split(ks[5])[1],
                             (item_num, hidden_size)),
        "b_q": jnp.zeros((item_num,), jnp.float32),
    }
    return params


if __name__ == "__main__":
    B, T = 2, 8
    hidden_size = 32
    item_num = 64

    key = jax.random.PRNGKey(0)
    k_params, k_state, k_len = jax.random.split(key, 3)

    params = init_params(k_params, item_num, hidden_size)

    state = jax.random.randint(k_state, (B, T), 1, item_num + 1, dtype=jnp.int32)
    state_length = jax.random.randint(k_len, (B,), 1, T + 1, dtype=jnp.int32)

    logits, q_values = qnetwork_forward(state, state_length, params)
    jax.block_until_ready((logits, q_values))

    assert logits.shape == (B, item_num)
    assert q_values.shape == (B, item_num)
    assert bool(jnp.all(jnp.isfinite(logits))) and bool(jnp.all(jnp.isfinite(q_values)))
    print("KERNEL_OK")
</pallas_src>

<mosaic_0001>
module attributes {stable_mosaic.version = 11 : i64} {
  func.func @qnetwork_kernel(%arg0: i32, %arg1: memref<1x64x128xbf16, #tpu.memory_space<vmem>>, %arg2: memref<1x8x1xi32, #tpu.memory_space<vmem>>, %arg3: memref<128x384xbf16, #tpu.memory_space<vmem>>, %arg4: memref<128x384xbf16, #tpu.memory_space<vmem>>, %arg5: memref<1x384xf32, #tpu.memory_space<vmem>>, %arg6: memref<1x384xf32, #tpu.memory_space<vmem>>, %arg7: memref<128x128xbf16, #tpu.memory_space<vmem>>, %arg8: memref<1x128xf32, #tpu.memory_space<vmem>>, %arg9: memref<8x128xf32, #tpu.memory_space<vmem>>) attributes {dimension_semantics = [#tpu.dimension_semantics<parallel>], iteration_bounds = array<i64: 1>, scalar_prefetch = 0 : i64, scratch_operands = 0 : i64, tpu.core_type = #tpu.core_type<tc>, window_params = [{transform_indices = @transform_0, window_bounds = array<i64: 1, 64, 128>}, {transform_indices = @transform_1, window_bounds = array<i64: 1, 8, 1>}, {pipeline_mode = #tpu.pipeline_mode<synchronous>, transform_indices = @transform_2, window_bounds = array<i64: 128, 384>}, {pipeline_mode = #tpu.pipeline_mode<synchronous>, transform_indices = @transform_3, window_bounds = array<i64: 128, 384>}, {pipeline_mode = #tpu.pipeline_mode<synchronous>, transform_indices = @transform_4, window_bounds = array<i64: 1, 384>}, {pipeline_mode = #tpu.pipeline_mode<synchronous>, transform_indices = @transform_5, window_bounds = array<i64: 1, 384>}, {pipeline_mode = #tpu.pipeline_mode<synchronous>, transform_indices = @transform_6, window_bounds = array<i64: 128, 128>}, {pipeline_mode = #tpu.pipeline_mode<synchronous>, transform_indices = @transform_7, window_bounds = array<i64: 1, 128>}, {transform_indices = @transform_8, window_bounds = array<i64: 8, 128>}]} {
    %c0 = arith.constant 0 : index
    %c0_0 = arith.constant 0 : index
    %0 = vector.load %arg4[%c0, %c0_0] : memref<128x384xbf16, #tpu.memory_space<vmem>>, vector<128x384xbf16>
    %c0_1 = arith.constant 0 : index
    %c0_2 = arith.constant 0 : index
    %c0_3 = arith.constant 0 : index
    %1 = vector.load %arg1[%c0_1, %c0_2, %c0_3] : memref<1x64x128xbf16, #tpu.memory_space<vmem>>, vector<1x64x128xbf16>
    %2 = vector.shape_cast %1 : vector<1x64x128xbf16> to vector<64x128xbf16>
    %c0_4 = arith.constant 0 : index
    %c0_5 = arith.constant 0 : index
    %3 = vector.load %arg3[%c0_4, %c0_5] : memref<128x384xbf16, #tpu.memory_space<vmem>>, vector<128x384xbf16>
    %cst = arith.constant dense<0.000000e+00> : vector<64x384xf32>
    %4 = tpu.matmul %2, %3, %cst {dimension_numbers = #tpu.dot_dimension_numbers<[1], [0], [0], [1], [0, 0, 1, 1], [], []>} : vector<64x128xbf16>, vector<128x384xbf16>, vector<64x384xf32> -> vector<64x384xf32>
    %c0_6 = arith.constant 0 : index
    %c0_7 = arith.constant 0 : index
    %5 = vector.load %arg5[%c0_6, %c0_7] : memref<1x384xf32, #tpu.memory_space<vmem>>, vector<1x384xf32>
    %6 = vector.broadcast %5 : vector<1x384xf32> to vector<64x384xf32>
    %7 = arith.addf %4, %6 : vector<64x384xf32>
    %c0_8 = arith.constant 0 : index
    %c0_9 = arith.constant 0 : index
    %8 = vector.load %arg6[%c0_8, %c0_9] : memref<1x384xf32, #tpu.memory_space<vmem>>, vector<1x384xf32>
    %9 = vector.shape_cast %8 : vector<1x384xf32> to vector<1x384xf32>
    %10 = vector.broadcast %9 : vector<1x384xf32> to vector<8x384xf32>
    %c0_10 = arith.constant 0 : index
    %c0_11 = arith.constant 0 : index
    %c0_12 = arith.constant 0 : index
    %11 = vector.load %arg2[%c0_10, %c0_11, %c0_12] : memref<1x8x1xi32, #tpu.memory_space<vmem>>, vector<1x8x1xi32>
    %12 = vector.shape_cast %11 : vector<1x8x1xi32> to vector<8x1xi32>
    %13 = vector.shape_cast %12 : vector<8x1xi32> to vector<8x1xi32>
    %14 = vector.broadcast %13 : vector<8x1xi32> to vector<8x128xi32>
    %cst_13 = arith.constant 0.000000e+00 : f32
    %15 = vector.broadcast %cst_13 : f32 to vector<8x128xf32>
    %16 = vector.extract_strided_slice %7 {offsets = [0, 0], sizes = [8, 384], strides = [1, 1]} : vector<64x384xf32> to vector<8x384xf32>
    %17 = arith.truncf %15 : vector<8x128xf32> to vector<8x128xbf16>
    %cst_14 = arith.constant dense<0.000000e+00> : vector<8x384xf32>
    %18 = tpu.matmul %17, %0, %cst_14 {dimension_numbers = #tpu.dot_dimension_numbers<[1], [0], [0], [1], [0, 0, 1, 1], [], []>} : vector<8x128xbf16>, vector<128x384xbf16>, vector<8x384xf32> -> vector<8x384xf32>
    %19 = arith.addf %18, %10 : vector<8x384xf32>
    %20 = vector.extract_strided_slice %16 {offsets = [0, 0], sizes = [8, 128], strides = [1, 1]} : vector<8x384xf32> to vector<8x128xf32>
    %21 = vector.extract_strided_slice %19 {offsets = [0, 0], sizes = [8, 128], strides = [1, 1]} : vector<8x384xf32> to vector<8x128xf32>
    %22 = arith.addf %20, %21 : vector<8x128xf32>
    %23 = arith.negf %22 : vector<8x128xf32>
    %24 = math.exp %23 : vector<8x128xf32>
    %cst_15 = arith.constant 1.000000e+00 : f32
    %25 = vector.broadcast %cst_15 : f32 to vector<8x128xf32>
    %26 = arith.addf %25, %24 : vector<8x128xf32>
    %27 = arith.divf %25, %26 : vector<8x128xf32>
    %28 = vector.extract_strided_slice %16 {offsets = [0, 128], sizes = [8, 128], strides = [1, 1]} : vector<8x384xf32> to vector<8x128xf32>
    %29 = vector.extract_strided_slice %19 {offsets = [0, 128], sizes = [8, 128], strides = [1, 1]} : vector<8x384xf32> to vector<8x128xf32>
    %30 = arith.addf %28, %29 : vector<8x128xf32>
    %31 = arith.negf %30 : vector<8x128xf32>
    %32 = math.exp %31 : vector<8x128xf32>
    %cst_16 = arith.constant 1.000000e+00 : f32
    %33 = vector.broadcast %cst_16 : f32 to vector<8x128xf32>
    %34 = arith.addf %33, %32 : vector<8x128xf32>
    %35 = arith.divf %33, %34 : vector<8x128xf32>
    %36 = vector.extract_strided_slice %16 {offsets = [0, 256], sizes = [8, 128], strides = [1, 1]} : vector<8x384xf32> to vector<8x128xf32>
    %37 = vector.extract_strided_slice %19 {offsets = [0, 256], sizes = [8, 128], strides = [1, 1]} : vector<8x384xf32> to vector<8x128xf32>
    %38 = arith.mulf %27, %37 : vector<8x128xf32>
    %39 = arith.addf %36, %38 : vector<8x128xf32>
    %40 = math.tanh %39 : vector<8x128xf32>
    %c0_i32 = arith.constant 0 : i32
    %41 = vector.broadcast %c0_i32 : i32 to vector<8x128xi32>
    %42 = arith.cmpi sgt, %14, %41 : vector<8x128xi32>
    %cst_17 = arith.constant 1.000000e+00 : f32
    %43 = vector.broadcast %cst_17 : f32 to vector<8x128xf32>
    %44 = arith.select %42, %35, %43 : vector<8x128xi1>, vector<8x128xf32>
    %45 = arith.subf %15, %40 : vector<8x128xf32>
    %46 = arith.mulf %44, %45 : vector<8x128xf32>
    %47 = arith.addf %40, %46 : vector<8x128xf32>
    %48 = vector.extract_strided_slice %7 {offsets = [8, 0], sizes = [8, 384], strides = [1, 1]} : vector<64x384xf32> to vector<8x384xf32>
    %49 = arith.truncf %47 : vector<8x128xf32> to vector<8x128xbf16>
    %cst_18 = arith.constant dense<0.000000e+00> : vector<8x384xf32>
    %50 = tpu.matmul %49, %0, %cst_18 {dimension_numbers = #tpu.dot_dimension_numbers<[1], [0], [0], [1], [0, 0, 1, 1], [], []>} : vector<8x128xbf16>, vector<128x384xbf16>, vector<8x384xf32> -> vector<8x384xf32>
    %51 = arith.addf %50, %10 : vector<8x384xf32>
    %52 = vector.extract_strided_slice %48 {offsets = [0, 0], sizes = [8, 128], strides = [1, 1]} : vector<8x384xf32> to vector<8x128xf32>
    %53 = vector.extract_strided_slice %51 {offsets = [0, 0], sizes = [8, 128], strides = [1, 1]} : vector<8x384xf32> to vector<8x128xf32>
    %54 = arith.addf %52, %53 : vector<8x128xf32>
    %55 = arith.negf %54 : vector<8x128xf32>
    %56 = math.exp %55 : vector<8x128xf32>
    %cst_19 = arith.constant 1.000000e+00 : f32
    %57 = vector.broadcast %cst_19 : f32 to vector<8x128xf32>
    %58 = arith.addf %57, %56 : vector<8x128xf32>
    %59 = arith.divf %57, %58 : vector<8x128xf32>
    %60 = vector.extract_strided_slice %48 {offsets = [0, 128], sizes = [8, 128], strides = [1, 1]} : vector<8x384xf32> to vector<8x128xf32>
    %61 = vector.extract_strided_slice %51 {offsets = [0, 128], sizes = [8, 128], strides = [1, 1]} : vector<8x384xf32> to vector<8x128xf32>
    %62 = arith.addf %60, %61 : vector<8x128xf32>
    %63 = arith.negf %62 : vector<8x128xf32>
    %64 = math.exp %63 : vector<8x128xf32>
    %cst_20 = arith.constant 1.000000e+00 : f32
    %65 = vector.broadcast %cst_20 : f32 to vector<8x128xf32>
    %66 = arith.addf %65, %64 : vector<8x128xf32>
    %67 = arith.divf %65, %66 : vector<8x128xf32>
    %68 = vector.extract_strided_slice %48 {offsets = [0, 256], sizes = [8, 128], strides = [1, 1]} : vector<8x384xf32> to vector<8x128xf32>
    %69 = vector.extract_strided_slice %51 {offsets = [0, 256], sizes = [8, 128], strides = [1, 1]} : vector<8x384xf32> to vector<8x128xf32>
    %70 = arith.mulf %59, %69 : vector<8x128xf32>
    %71 = arith.addf %68, %70 : vector<8x128xf32>
    %72 = math.tanh %71 : vector<8x128xf32>
    %c1_i32 = arith.constant 1 : i32
    %73 = vector.broadcast %c1_i32 : i32 to vector<8x128xi32>
    %74 = arith.cmpi sgt, %14, %73 : vector<8x128xi32>
    %cst_21 = arith.constant 1.000000e+00 : f32
    %75 = vector.broadcast %cst_21 : f32 to vector<8x128xf32>
    %76 = arith.select %74, %67, %75 : vector<8x128xi1>, vector<8x128xf32>
    %77 = arith.subf %47, %72 : vector<8x128xf32>
    %78 = arith.mulf %76, %77 : vector<8x128xf32>
    %79 = arith.addf %72, %78 : vector<8x128xf32>
    %80 = vector.extract_strided_slice %7 {offsets = [16, 0], sizes = [8, 384], strides = [1, 1]} : vector<64x384xf32> to vector<8x384xf32>
    %81 = arith.truncf %79 : vector<8x128xf32> to vector<8x128xbf16>
    %cst_22 = arith.constant dense<0.000000e+00> : vector<8x384xf32>
    %82 = tpu.matmul %81, %0, %cst_22 {dimension_numbers = #tpu.dot_dimension_numbers<[1], [0], [0], [1], [0, 0, 1, 1], [], []>} : vector<8x128xbf16>, vector<128x384xbf16>, vector<8x384xf32> -> vector<8x384xf32>
    %83 = arith.addf %82, %10 : vector<8x384xf32>
    %84 = vector.extract_strided_slice %80 {offsets = [0, 0], sizes = [8, 128], strides = [1, 1]} : vector<8x384xf32> to vector<8x128xf32>
    %85 = vector.extract_strided_slice %83 {offsets = [0, 0], sizes = [8, 128], strides = [1, 1]} : vector<8x384xf32> to vector<8x128xf32>
    %86 = arith.addf %84, %85 : vector<8x128xf32>
    %87 = arith.negf %86 : vector<8x128xf32>
    %88 = math.exp %87 : vector<8x128xf32>
    %cst_23 = arith.constant 1.000000e+00 : f32
    %89 = vector.broadcast %cst_23 : f32 to vector<8x128xf32>
    %90 = arith.addf %89, %88 : vector<8x128xf32>
    %91 = arith.divf %89, %90 : vector<8x128xf32>
    %92 = vector.extract_strided_slice %80 {offsets = [0, 128], sizes = [8, 128], strides = [1, 1]} : vector<8x384xf32> to vector<8x128xf32>
    %93 = vector.extract_strided_slice %83 {offsets = [0, 128], sizes = [8, 128], strides = [1, 1]} : vector<8x384xf32> to vector<8x128xf32>
    %94 = arith.addf %92, %93 : vector<8x128xf32>
    %95 = arith.negf %94 : vector<8x128xf32>
    %96 = math.exp %95 : vector<8x128xf32>
    %cst_24 = arith.constant 1.000000e+00 : f32
    %97 = vector.broadcast %cst_24 : f32 to vector<8x128xf32>
    %98 = arith.addf %97, %96 : vector<8x128xf32>
    %99 = arith.divf %97, %98 : vector<8x128xf32>
    %100 = vector.extract_strided_slice %80 {offsets = [0, 256], sizes = [8, 128], strides = [1, 1]} : vector<8x384xf32> to vector<8x128xf32>
    %101 = vector.extract_strided_slice %83 {offsets = [0, 256], sizes = [8, 128], strides = [1, 1]} : vector<8x384xf32> to vector<8x128xf32>
    %102 = arith.mulf %91, %101 : vector<8x128xf32>
    %103 = arith.addf %100, %102 : vector<8x128xf32>
    %104 = math.tanh %103 : vector<8x128xf32>
    %c2_i32 = arith.constant 2 : i32
    %105 = vector.broadcast %c2_i32 : i32 to vector<8x128xi32>
    %106 = arith.cmpi sgt, %14, %105 : vector<8x128xi32>
    %cst_25 = arith.constant 1.000000e+00 : f32
    %107 = vector.broadcast %cst_25 : f32 to vector<8x128xf32>
    %108 = arith.select %106, %99, %107 : vector<8x128xi1>, vector<8x128xf32>
    %109 = arith.subf %79, %104 : vector<8x128xf32>
    %110 = arith.mulf %108, %109 : vector<8x128xf32>
    %111 = arith.addf %104, %110 : vector<8x128xf32>
    %112 = vector.extract_strided_slice %7 {offsets = [24, 0], sizes = [8, 384], strides = [1, 1]} : vector<64x384xf32> to vector<8x384xf32>
    %113 = arith.truncf %111 : vector<8x128xf32> to vector<8x128xbf16>
    %cst_26 = arith.constant dense<0.000000e+00> : vector<8x384xf32>
    %114 = tpu.matmul %113, %0, %cst_26 {dimension_numbers = #tpu.dot_dimension_numbers<[1], [0], [0], [1], [0, 0, 1, 1], [], []>} : vector<8x128xbf16>, vector<128x384xbf16>, vector<8x384xf32> -> vector<8x384xf32>
    %115 = arith.addf %114, %10 : vector<8x384xf32>
    %116 = vector.extract_strided_slice %112 {offsets = [0, 0], sizes = [8, 128], strides = [1, 1]} : vector<8x384xf32> to vector<8x128xf32>
    %117 = vector.extract_strided_slice %115 {offsets = [0, 0], sizes = [8, 128], strides = [1, 1]} : vector<8x384xf32> to vector<8x128xf32>
    %118 = arith.addf %116, %117 : vector<8x128xf32>
    %119 = arith.negf %118 : vector<8x128xf32>
    %120 = math.exp %119 : vector<8x128xf32>
    %cst_27 = arith.constant 1.000000e+00 : f32
    %121 = vector.broadcast %cst_27 : f32 to vector<8x128xf32>
    %122 = arith.addf %121, %120 : vector<8x128xf32>
    %123 = arith.divf %121, %122 : vector<8x128xf32>
    %124 = vector.extract_strided_slice %112 {offsets = [0, 128], sizes = [8, 128], strides = [1, 1]} : vector<8x384xf32> to vector<8x128xf32>
    %125 = vector.extract_strided_slice %115 {offsets = [0, 128], sizes = [8, 128], strides = [1, 1]} : vector<8x384xf32> to vector<8x128xf32>
    %126 = arith.addf %124, %125 : vector<8x128xf32>
    %127 = arith.negf %126 : vector<8x128xf32>
    %128 = math.exp %127 : vector<8x128xf32>
    %cst_28 = arith.constant 1.000000e+00 : f32
    %129 = vector.broadcast %cst_28 : f32 to vector<8x128xf32>
    %130 = arith.addf %129, %128 : vector<8x128xf32>
    %131 = arith.divf %129, %130 : vector<8x128xf32>
    %132 = vector.extract_strided_slice %112 {offsets = [0, 256], sizes = [8, 128], strides = [1, 1]} : vector<8x384xf32> to vector<8x128xf32>
    %133 = vector.extract_strided_slice %115 {offsets = [0, 256], sizes = [8, 128], strides = [1, 1]} : vector<8x384xf32> to vector<8x128xf32>
    %134 = arith.mulf %123, %133 : vector<8x128xf32>
    %135 = arith.addf %132, %134 : vector<8x128xf32>
    %136 = math.tanh %135 : vector<8x128xf32>
    %c3_i32 = arith.constant 3 : i32
    %137 = vector.broadcast %c3_i32 : i32 to vector<8x128xi32>
    %138 = arith.cmpi sgt, %14, %137 : vector<8x128xi32>
    %cst_29 = arith.constant 1.000000e+00 : f32
    %139 = vector.broadcast %cst_29 : f32 to vector<8x128xf32>
    %140 = arith.select %138, %131, %139 : vector<8x128xi1>, vector<8x128xf32>
    %141 = arith.subf %111, %136 : vector<8x128xf32>
    %142 = arith.mulf %140, %141 : vector<8x128xf32>
    %143 = arith.addf %136, %142 : vector<8x128xf32>
    %144 = vector.extract_strided_slice %7 {offsets = [32, 0], sizes = [8, 384], strides = [1, 1]} : vector<64x384xf32> to vector<8x384xf32>
    %145 = arith.truncf %143 : vector<8x128xf32> to vector<8x128xbf16>
    %cst_30 = arith.constant dense<0.000000e+00> : vector<8x384xf32>
    %146 = tpu.matmul %145, %0, %cst_30 {dimension_numbers = #tpu.dot_dimension_numbers<[1], [0], [0], [1], [0, 0, 1, 1], [], []>} : vector<8x128xbf16>, vector<128x384xbf16>, vector<8x384xf32> -> vector<8x384xf32>
    %147 = arith.addf %146, %10 : vector<8x384xf32>
    %148 = vector.extract_strided_slice %144 {offsets = [0, 0], sizes = [8, 128], strides = [1, 1]} : vector<8x384xf32> to vector<8x128xf32>
    %149 = vector.extract_strided_slice %147 {offsets = [0, 0], sizes = [8, 128], strides = [1, 1]} : vector<8x384xf32> to vector<8x128xf32>
    %150 = arith.addf %148, %149 : vector<8x128xf32>
    %151 = arith.negf %150 : vector<8x128xf32>
    %152 = math.exp %151 : vector<8x128xf32>
    %cst_31 = arith.constant 1.000000e+00 : f32
    %153 = vector.broadcast %cst_31 : f32 to vector<8x128xf32>
    %154 = arith.addf %153, %152 : vector<8x128xf32>
    %155 = arith.divf %153, %154 : vector<8x128xf32>
    %156 = vector.extract_strided_slice %144 {offsets = [0, 128], sizes = [8, 128], strides = [1, 1]} : vector<8x384xf32> to vector<8x128xf32>
    %157 = vector.extract_strided_slice %147 {offsets = [0, 128], sizes = [8, 128], strides = [1, 1]} : vector<8x384xf32> to vector<8x128xf32>
    %158 = arith.addf %156, %157 : vector<8x128xf32>
    %159 = arith.negf %158 : vector<8x128xf32>
    %160 = math.exp %159 : vector<8x128xf32>
    %cst_32 = arith.constant 1.000000e+00 : f32
    %161 = vector.broadcast %cst_32 : f32 to vector<8x128xf32>
    %162 = arith.addf %161, %160 : vector<8x128xf32>
    %163 = arith.divf %161, %162 : vector<8x128xf32>
    %164 = vector.extract_strided_slice %144 {offsets = [0, 256], sizes = [8, 128], strides = [1, 1]} : vector<8x384xf32> to vector<8x128xf32>
    %165 = vector.extract_strided_slice %147 {offsets = [0, 256], sizes = [8, 128], strides = [1, 1]} : vector<8x384xf32> to vector<8x128xf32>
    %166 = arith.mulf %155, %165 : vector<8x128xf32>
    %167 = arith.addf %164, %166 : vector<8x128xf32>
    %168 = math.tanh %167 : vector<8x128xf32>
    %c4_i32 = arith.constant 4 : i32
    %169 = vector.broadcast %c4_i32 : i32 to vector<8x128xi32>
    %170 = arith.cmpi sgt, %14, %169 : vector<8x128xi32>
    %cst_33 = arith.constant 1.000000e+00 : f32
    %171 = vector.broadcast %cst_33 : f32 to vector<8x128xf32>
    %172 = arith.select %170, %163, %171 : vector<8x128xi1>, vector<8x128xf32>
    %173 = arith.subf %143, %168 : vector<8x128xf32>
    %174 = arith.mulf %172, %173 : vector<8x128xf32>
    %175 = arith.addf %168, %174 : vector<8x128xf32>
    %176 = vector.extract_strided_slice %7 {offsets = [40, 0], sizes = [8, 384], strides = [1, 1]} : vector<64x384xf32> to vector<8x384xf32>
    %177 = arith.truncf %175 : vector<8x128xf32> to vector<8x128xbf16>
    %cst_34 = arith.constant dense<0.000000e+00> : vector<8x384xf32>
    %178 = tpu.matmul %177, %0, %cst_34 {dimension_numbers = #tpu.dot_dimension_numbers<[1], [0], [0], [1], [0, 0, 1, 1], [], []>} : vector<8x128xbf16>, vector<128x384xbf16>, vector<8x384xf32> -> vector<8x384xf32>
    %179 = arith.addf %178, %10 : vector<8x384xf32>
    %180 = vector.extract_strided_slice %176 {offsets = [0, 0], sizes = [8, 128], strides = [1, 1]} : vector<8x384xf32> to vector<8x128xf32>
    %181 = vector.extract_strided_slice %179 {offsets = [0, 0], sizes = [8, 128], strides = [1, 1]} : vector<8x384xf32> to vector<8x128xf32>
    %182 = arith.addf %180, %181 : vector<8x128xf32>
    %183 = arith.negf %182 : vector<8x128xf32>
    %184 = math.exp %183 : vector<8x128xf32>
    %cst_35 = arith.constant 1.000000e+00 : f32
    %185 = vector.broadcast %cst_35 : f32 to vector<8x128xf32>
    %186 = arith.addf %185, %184 : vector<8x128xf32>
    %187 = arith.divf %185, %186 : vector<8x128xf32>
    %188 = vector.extract_strided_slice %176 {offsets = [0, 128], sizes = [8, 128], strides = [1, 1]} : vector<8x384xf32> to vector<8x128xf32>
    %189 = vector.extract_strided_slice %179 {offsets = [0, 128], sizes = [8, 128], strides = [1, 1]} : vector<8x384xf32> to vector<8x128xf32>
    %190 = arith.addf %188, %189 : vector<8x128xf32>
    %191 = arith.negf %190 : vector<8x128xf32>
    %192 = math.exp %191 : vector<8x128xf32>
    %cst_36 = arith.constant 1.000000e+00 : f32
    %193 = vector.broadcast %cst_36 : f32 to vector<8x128xf32>
    %194 = arith.addf %193, %192 : vector<8x128xf32>
    %195 = arith.divf %193, %194 : vector<8x128xf32>
    %196 = vector.extract_strided_slice %176 {offsets = [0, 256], sizes = [8, 128], strides = [1, 1]} : vector<8x384xf32> to vector<8x128xf32>
    %197 = vector.extract_strided_slice %179 {offsets = [0, 256], sizes = [8, 128], strides = [1, 1]} : vector<8x384xf32> to vector<8x128xf32>
    %198 = arith.mulf %187, %197 : vector<8x128xf32>
    %199 = arith.addf %196, %198 : vector<8x128xf32>
    %200 = math.tanh %199 : vector<8x128xf32>
    %c5_i32 = arith.constant 5 : i32
    %201 = vector.broadcast %c5_i32 : i32 to vector<8x128xi32>
    %202 = arith.cmpi sgt, %14, %201 : vector<8x128xi32>
    %cst_37 = arith.constant 1.000000e+00 : f32
    %203 = vector.broadcast %cst_37 : f32 to vector<8x128xf32>
    %204 = arith.select %202, %195, %203 : vector<8x128xi1>, vector<8x128xf32>
    %205 = arith.subf %175, %200 : vector<8x128xf32>
    %206 = arith.mulf %204, %205 : vector<8x128xf32>
    %207 = arith.addf %200, %206 : vector<8x128xf32>
    %208 = vector.extract_strided_slice %7 {offsets = [48, 0], sizes = [8, 384], strides = [1, 1]} : vector<64x384xf32> to vector<8x384xf32>
    %209 = arith.truncf %207 : vector<8x128xf32> to vector<8x128xbf16>
    %cst_38 = arith.constant dense<0.000000e+00> : vector<8x384xf32>
    %210 = tpu.matmul %209, %0, %cst_38 {dimension_numbers = #tpu.dot_dimension_numbers<[1], [0], [0], [1], [0, 0, 1, 1], [], []>} : vector<8x128xbf16>, vector<128x384xbf16>, vector<8x384xf32> -> vector<8x384xf32>
    %211 = arith.addf %210, %10 : vector<8x384xf32>
    %212 = vector.extract_strided_slice %208 {offsets = [0, 0], sizes = [8, 128], strides = [1, 1]} : vector<8x384xf32> to vector<8x128xf32>
    %213 = vector.extract_strided_slice %211 {offsets = [0, 0], sizes = [8, 128], strides = [1, 1]} : vector<8x384xf32> to vector<8x128xf32>
    %214 = arith.addf %212, %213 : vector<8x128xf32>
    %215 = arith.negf %214 : vector<8x128xf32>
    %216 = math.exp %215 : vector<8x128xf32>
    %cst_39 = arith.constant 1.000000e+00 : f32
    %217 = vector.broadcast %cst_39 : f32 to vector<8x128xf32>
    %218 = arith.addf %217, %216 : vector<8x128xf32>
    %219 = arith.divf %217, %218 : vector<8x128xf32>
    %220 = vector.extract_strided_slice %208 {offsets = [0, 128], sizes = [8, 128], strides = [1, 1]} : vector<8x384xf32> to vector<8x128xf32>
    %221 = vector.extract_strided_slice %211 {offsets = [0, 128], sizes = [8, 128], strides = [1, 1]} : vector<8x384xf32> to vector<8x128xf32>
    %222 = arith.addf %220, %221 : vector<8x128xf32>
    %223 = arith.negf %222 : vector<8x128xf32>
    %224 = math.exp %223 : vector<8x128xf32>
    %cst_40 = arith.constant 1.000000e+00 : f32
    %225 = vector.broadcast %cst_40 : f32 to vector<8x128xf32>
    %226 = arith.addf %225, %224 : vector<8x128xf32>
    %227 = arith.divf %225, %226 : vector<8x128xf32>
    %228 = vector.extract_strided_slice %208 {offsets = [0, 256], sizes = [8, 128], strides = [1, 1]} : vector<8x384xf32> to vector<8x128xf32>
    %229 = vector.extract_strided_slice %211 {offsets = [0, 256], sizes = [8, 128], strides = [1, 1]} : vector<8x384xf32> to vector<8x128xf32>
    %230 = arith.mulf %219, %229 : vector<8x128xf32>
    %231 = arith.addf %228, %230 : vector<8x128xf32>
    %232 = math.tanh %231 : vector<8x128xf32>
    %c6_i32 = arith.constant 6 : i32
    %233 = vector.broadcast %c6_i32 : i32 to vector<8x128xi32>
    %234 = arith.cmpi sgt, %14, %233 : vector<8x128xi32>
    %cst_41 = arith.constant 1.000000e+00 : f32
    %235 = vector.broadcast %cst_41 : f32 to vector<8x128xf32>
    %236 = arith.select %234, %227, %235 : vector<8x128xi1>, vector<8x128xf32>
    %237 = arith.subf %207, %232 : vector<8x128xf32>
    %238 = arith.mulf %236, %237 : vector<8x128xf32>
    %239 = arith.addf %232, %238 : vector<8x128xf32>
    %240 = vector.extract_strided_slice %7 {offsets = [56, 0], sizes = [8, 384], strides = [1, 1]} : vector<64x384xf32> to vector<8x384xf32>
    %241 = arith.truncf %239 : vector<8x128xf32> to vector<8x128xbf16>
    %cst_42 = arith.constant dense<0.000000e+00> : vector<8x384xf32>
    %242 = tpu.matmul %241, %0, %cst_42 {dimension_numbers = #tpu.dot_dimension_numbers<[1], [0], [0], [1], [0, 0, 1, 1], [], []>} : vector<8x128xbf16>, vector<128x384xbf16>, vector<8x384xf32> -> vector<8x384xf32>
    %243 = arith.addf %242, %10 : vector<8x384xf32>
    %244 = vector.extract_strided_slice %240 {offsets = [0, 0], sizes = [8, 128], strides = [1, 1]} : vector<8x384xf32> to vector<8x128xf32>
    %245 = vector.extract_strided_slice %243 {offsets = [0, 0], sizes = [8, 128], strides = [1, 1]} : vector<8x384xf32> to vector<8x128xf32>
    %246 = arith.addf %244, %245 : vector<8x128xf32>
    %247 = arith.negf %246 : vector<8x128xf32>
    %248 = math.exp %247 : vector<8x128xf32>
    %cst_43 = arith.constant 1.000000e+00 : f32
    %249 = vector.broadcast %cst_43 : f32 to vector<8x128xf32>
    %250 = arith.addf %249, %248 : vector<8x128xf32>
    %251 = arith.divf %249, %250 : vector<8x128xf32>
    %252 = vector.extract_strided_slice %240 {offsets = [0, 128], sizes = [8, 128], strides = [1, 1]} : vector<8x384xf32> to vector<8x128xf32>
    %253 = vector.extract_strided_slice %243 {offsets = [0, 128], sizes = [8, 128], strides = [1, 1]} : vector<8x384xf32> to vector<8x128xf32>
    %254 = arith.addf %252, %253 : vector<8x128xf32>
    %255 = arith.negf %254 : vector<8x128xf32>
    %256 = math.exp %255 : vector<8x128xf32>
    %cst_44 = arith.constant 1.000000e+00 : f32
    %257 = vector.broadcast %cst_44 : f32 to vector<8x128xf32>
    %258 = arith.addf %257, %256 : vector<8x128xf32>
    %259 = arith.divf %257, %258 : vector<8x128xf32>
    %260 = vector.extract_strided_slice %240 {offsets = [0, 256], sizes = [8, 128], strides = [1, 1]} : vector<8x384xf32> to vector<8x128xf32>
    %261 = vector.extract_strided_slice %243 {offsets = [0, 256], sizes = [8, 128], strides = [1, 1]} : vector<8x384xf32> to vector<8x128xf32>
    %262 = arith.mulf %251, %261 : vector<8x128xf32>
    %263 = arith.addf %260, %262 : vector<8x128xf32>
    %264 = math.tanh %263 : vector<8x128xf32>
    %c7_i32 = arith.constant 7 : i32
    %265 = vector.broadcast %c7_i32 : i32 to vector<8x128xi32>
    %266 = arith.cmpi sgt, %14, %265 : vector<8x128xi32>
    %cst_45 = arith.constant 1.000000e+00 : f32
    %267 = vector.broadcast %cst_45 : f32 to vector<8x128xf32>
    %268 = arith.select %266, %259, %267 : vector<8x128xi1>, vector<8x128xf32>
    %269 = arith.subf %239, %264 : vector<8x128xf32>
    %270 = arith.mulf %268, %269 : vector<8x128xf32>
    %271 = arith.addf %264, %270 : vector<8x128xf32>
    %272 = arith.truncf %271 : vector<8x128xf32> to vector<8x128xbf16>
    %c0_46 = arith.constant 0 : index
    %c0_47 = arith.constant 0 : index
    %273 = vector.load %arg7[%c0_46, %c0_47] : memref<128x128xbf16, #tpu.memory_space<vmem>>, vector<128x128xbf16>
    %cst_48 = arith.constant dense<0.000000e+00> : vector<8x128xf32>
    %274 = tpu.matmul %272, %273, %cst_48 {dimension_numbers = #tpu.dot_dimension_numbers<[1], [0], [0], [1], [0, 0, 1, 1], [], []>} : vector<8x128xbf16>, vector<128x128xbf16>, vector<8x128xf32> -> vector<8x128xf32>
    %c0_49 = arith.constant 0 : index
    %c0_50 = arith.constant 0 : index
    %275 = vector.load %arg8[%c0_49, %c0_50] : memref<1x128xf32, #tpu.memory_space<vmem>>, vector<1x128xf32>
    %276 = vector.broadcast %275 : vector<1x128xf32> to vector<8x128xf32>
    %277 = arith.addf %274, %276 : vector<8x128xf32>
    %c0_51 = arith.constant 0 : index
    %c0_52 = arith.constant 0 : index
    %278 = vector.load %arg9[%c0_51, %c0_52] : memref<8x128xf32, #tpu.memory_space<vmem>>, vector<8x128xf32>
    tpu.vector_store %arg9[%c0_51, %c0_52], %277 {strides = array<i32>} : memref<8x128xf32, #tpu.memory_space<vmem>>, vector<8x128xf32>,
    return
  }
  func.func @transform_0(%arg0: i32) -> (i32, i32, i32) {
    %c0_i32 = arith.constant 0 : i32
    %c0_i32_0 = arith.constant 0 : i32
    %c0_i32_1 = arith.constant 0 : i32
    return %arg0, %c0_i32, %c0_i32_0 : i32, i32, i32
  }
  func.func @transform_1(%arg0: i32) -> (i32, i32, i32) {
    %c0_i32 = arith.constant 0 : i32
    %c0_i32_0 = arith.constant 0 : i32
    %c0_i32_1 = arith.constant 0 : i32
    return %arg0, %c0_i32, %c0_i32_0 : i32, i32, i32
  }
  func.func @transform_2(%arg0: i32) -> (i32, i32) {
    %c0_i32 = arith.constant 0 : i32
    %c0_i32_0 = arith.constant 0 : i32
    %c0_i32_1 = arith.constant 0 : i32
    return %c0_i32, %c0_i32_0 : i32, i32
  }
  func.func @transform_3(%arg0: i32) -> (i32, i32) {
    %c0_i32 = arith.constant 0 : i32
    %c0_i32_0 = arith.constant 0 : i32
    %c0_i32_1 = arith.constant 0 : i32
    return %c0_i32, %c0_i32_0 : i32, i32
  }
  func.func @transform_4(%arg0: i32) -> (i32, i32) {
    %c0_i32 = arith.constant 0 : i32
    %c0_i32_0 = arith.constant 0 : i32
    %c0_i32_1 = arith.constant 0 : i32
    return %c0_i32, %c0_i32_0 : i32, i32
  }
  func.func @transform_5(%arg0: i32) -> (i32, i32) {
    %c0_i32 = arith.constant 0 : i32
    %c0_i32_0 = arith.constant 0 : i32
    %c0_i32_1 = arith.constant 0 : i32
    return %c0_i32, %c0_i32_0 : i32, i32
  }
  func.func @transform_6(%arg0: i32) -> (i32, i32) {
    %c0_i32 = arith.constant 0 : i32
    %c0_i32_0 = arith.constant 0 : i32
    %c0_i32_1 = arith.constant 0 : i32
    return %c0_i32, %c0_i32_0 : i32, i32
  }
  func.func @transform_7(%arg0: i32) -> (i32, i32) {
    %c0_i32 = arith.constant 0 : i32
    %c0_i32_0 = arith.constant 0 : i32
    %c0_i32_1 = arith.constant 0 : i32
    return %c0_i32, %c0_i32_0 : i32, i32
  }
  func.func @transform_8(%arg0: i32) -> (i32, i32) {
    %c0_i32 = arith.constant 0 : i32
    %c0_i32_0 = arith.constant 0 : i32
    return %arg0, %c0_i32 : i32, i32
  }
}

</mosaic_0001>

<bundles_post_ra>
// kernel: tpu_custom_call.1
= control target key start
LH: loop header
LB: loop body
LE: loop exit
PB: predicated region body
PF: predicated region fallthrough
CT: control target
= control target key end

     0   :  { %13 = vsyncpa [#allocation3], 0  ;;  %s2899_s0 = inlined_call_operand.hbm [shape: bf16[1,64,128], index: 0, kind: input, shape index: {}]   ;;  %s2900_s1 = inlined_call_operand.vmem [shape: s32[1,8,1], index: 1, kind: input, shape index: {}]   ;;  %s2901_s2 = inlined_call_operand.hbm [shape: bf16[128,384], index: 2, kind: input, shape index: {}]   ;;  %s2902_s3 = inlined_call_operand.hbm [shape: bf16[128,384], index: 3, kind: input, shape index: {}]   ;;  %s2903_s4 = inlined_call_operand.vmem [shape: f32[1,384], index: 4, kind: input, shape index: {}]   ;;  %s2904_s5 = inlined_call_operand.vmem [shape: f32[1,384], index: 5, kind: input, shape index: {}]   ;;  %s2905_s6 = inlined_call_operand.hbm [shape: bf16[128,128], index: 6, kind: input, shape index: {}]   ;;  %s2906_s7 = inlined_call_operand.vmem [shape: f32[1,128], index: 7, kind: input, shape index: {}]   ;;  %s2907_s8 = inlined_call_operand.hbm [shape: f32[8,128], index: 8, kind: output, shape index: {}]  }
   0x1   :  { %14 = vsyncpa [#allocation6], 0 }
   0x2   :  { %15 = vsyncpa [#allocation9], 0 }
   0x3   :  { %16 = vsyncpa [#allocation4], 0  ;;  %s2260_s27 = smov [#allocation5]   ;;  %s2142_s9 = scalar_lea.hbm %s2901_s2, 3072 }
   0x4   :  { %s36_s28 = sshll.u32 %s2260_s27, 4  ;;  %p2143_p0 = scmp.ne.s32.totalorder %s2901_s2, %s2142_s9  ;;  %s37_s28 = int_to_ptr.vmem [resolvable:$true] %s36_s28 }
   0x5   :  { %p2146_p1 = scmp.lt.u32.totalorder %s2142_s9, %s2901_s2 }
   0x7   :  { %p2148_p2 = pnand %p2146_p1, %p2143_p0 }
   0x9   :  { %2151 = shalt.err (!%p2148_p2)
}
   0xa   :  { %s2152_s14 = scalar_lea.vmem %s37_s28, 3072  ;;  %p2157_p4 = scmp.lt.s32.totalorder %s37_s28, %s37_s28 }
   0xb   :  { %p2153_p3 = scmp.ne.s32.totalorder %s37_s28, %s2152_s14  ;;  %p2158_p5 = scmp.lt.s32.totalorder %s2152_s14, %s2152_s14 }
   0xd   :  { %p2159_p6 = por %p2158_p5, %p2157_p4 }
   0xf   :  { %p2160_p7 = pnand %p2159_p6, %p2153_p3 }
  0x11   :  { %2163 = shalt.err (!%p2160_p7)
}
  0x12   :  { %s2261_s15 = smov 192   ;;  %s2262_s16 = smov 12  }
  0x13   :  { %42 = dma.hbm_to_vmem [thread:$0]  %s2901_s2, 3072, %s37_s28, [#allocation6], %s2261_s15, %s2261_s15, %s2262_s16  }
  0x14   :  { %s2263_s19 = smov [#allocation2]   ;;  %s2164_s23 = scalar_lea.hbm %s2899_s0, 512 }
  0x15   :  { %s22_s20 = sshll.u32 %s2263_s19, 4  ;;  %p2165_p8 = scmp.ne.s32.totalorder %s2899_s0, %s2164_s23  ;;  %s23_s20 = int_to_ptr.vmem [resolvable:$true] %s22_s20 }
  0x16   :  { %p2168_p9 = scmp.lt.u32.totalorder %s2164_s23, %s2899_s0 }
  0x18   :  { %p2170_p10 = pnand %p2168_p9, %p2165_p8 }
  0x1a   :  { %2173 = shalt.err (!%p2170_p10)
}
  0x1b   :  { %s2174_s29 = scalar_lea.vmem %s23_s20, 512  ;;  %p2179_p12 = scmp.lt.s32.totalorder %s23_s20, %s23_s20 }
  0x1c   :  { %p2175_p11 = scmp.ne.s32.totalorder %s23_s20, %s2174_s29  ;;  %p2180_p13 = scmp.lt.s32.totalorder %s2174_s29, %s2174_s29 }
  0x1e   :  { %p2181_p0 = por %p2180_p13, %p2179_p12 }
  0x20   :  { %p2182_p1 = pnand %p2181_p0, %p2175_p11 }
  0x22   :  { %2185 = shalt.err (!%p2182_p1)
}
  0x23   :  { %s2264_s2 = smov 64   ;;  %s2265_s28 = smov 4  }
  0x24   :  { %28 = dma.hbm_to_vmem [thread:$0]  %s2899_s0, 512, %s23_s20, [#allocation3], %s2264_s2, %s2264_s2, %s2265_s28  }
  0x25   :  { %s2266_s10 = smov [#allocation7]   ;;  %s2267_s12 = smov [#allocation8]  }
  0x26   :  { %s48_s11 = sshll.u32 %s2266_s10, 4  ;;  %s64_s13 = sshll.u32 %s2267_s12, 4  ;;  %s49_s11 = int_to_ptr.vmem [resolvable:$true] %s48_s11  ;;  %s2347_s13 = int_to_ptr.vmem [resolvable:$true] %s64_s13 }
  0x27   :  { %s2186_s18 = scalar_lea.hbm %s2902_s3, 3072 }
  0x28   :  { %p2187_p2 = scmp.ne.s32.totalorder %s2902_s3, %s2186_s18  ;;  %p2190_p3 = scmp.lt.u32.totalorder %s2186_s18, %s2902_s3 }
  0x2a   :  { %p2192_p4 = pnand %p2190_p3, %p2187_p2 }
  0x2c   :  { %2195 = shalt.err (!%p2192_p4)
}
  0x2d   :  { %s2196_s0 = scalar_lea.vmem %s49_s11, 3072  ;;  %p2201_p6 = scmp.lt.s32.totalorder %s49_s11, %s49_s11 }
  0x2e   :  { %p2197_p5 = scmp.ne.s32.totalorder %s49_s11, %s2196_s0  ;;  %p2202_p7 = scmp.lt.s32.totalorder %s2196_s0, %s2196_s0 }
  0x30   :  { %p2203_p8 = por %p2202_p7, %p2201_p6 }
  0x32   :  { %p2204_p9 = pnand %p2203_p8, %p2197_p5 }
  0x34   :  { %2207 = shalt.err (!%p2204_p9)
}
  0x35   :  { %54 = dma.hbm_to_vmem [thread:$0]  %s2902_s3, 3072, %s49_s11, [#allocation6], %s2261_s15, %s2261_s15, %s2262_s16  }
  0x36   :  { %s2208_s27 = scalar_lea.hbm %s2905_s6, 1024 }
  0x37   :  { %p2209_p10 = scmp.ne.s32.totalorder %s2905_s6, %s2208_s27  ;;  %p2212_p11 = scmp.lt.u32.totalorder %s2208_s27, %s2905_s6 }
  0x39   :  { %p2214_p12 = pnand %p2212_p11, %p2209_p10 }
  0x3b   :  { %2217 = shalt.err (!%p2214_p12)
}
  0x3c   :  { %s2218_s12 = scalar_lea.vmem %s2347_s13, 1024  ;;  %p2223_p0 = scmp.lt.s32.totalorder %s2347_s13, %s2347_s13 }
  0x3d   :  { %p2219_p13 = scmp.ne.s32.totalorder %s2347_s13, %s2218_s12  ;;  %p2224_p1 = scmp.lt.s32.totalorder %s2218_s12, %s2218_s12 }
  0x3f   :  { %p2225_p2 = por %p2224_p1, %p2223_p0 }
  0x41   :  { %p2226_p3 = pnand %p2225_p2, %p2219_p13 }
  0x43   :  { %2229 = shalt.err (!%p2226_p3)
}
  0x44   :  { %70 = dma.hbm_to_vmem [thread:$0]  %s2905_s6, 1024, %s2347_s13, [#allocation9], %s2264_s2, %s2264_s2, %s2265_s28  }
  0x45   :  { %2252 = dma.done.wait [#allocation3], 512  }
  0x46   :  { %2253 = vsyncadd [#allocation3], 4294966784 }
  0x47   :  { %2254 = dma.done.wait [#allocation6], 6144  }
  0x48   :  { %2255 = vsyncadd [#allocation6], 4294961152 }
  0x49   :  { %2256 = dma.done.wait [#allocation9], 1024  }
  0x4a   :  { %2257 = vsyncadd [#allocation9], 4294966272  ;;  %v2908_v0 = vmov 0   ;;  %v1962_v1 = vld [vmem:[#allocation5 + $0x4] ss:$12 sps:$4 sm:$0xff]   ;;  %v1997_v31 = vld [vmem:[#allocation2 + $0x8] sm:$0xff]   ;;  %v160_v55 = vlaneseq }
  0x4b   :  { %359 = vmatprep.mubr.bf16.mxu0 %v2908_v0  ;;  %1961 = vset.pattern.permute.xlu0 %v2908_v0  ;;  %v1964_v2 = vld [vmem:[#allocation5] ss:$12 sps:$4 sm:$0xff]   ;;  %v1965_v3 = vld [vmem:[#allocation5 + $0x1c] ss:$12 sps:$4 sm:$0xff]   ;;  %v1967_v4 = vld [vmem:[#allocation5 + $0x18] ss:$12 sps:$4 sm:$0xff]  }
  0x4c   :  { %327 = vmatprep.subr.bf16.mxu0 %v1962_v1  ;;  %v1968_v5 = vld [vmem:[#allocation5 + $0x34] ss:$12 sps:$4 sm:$0xff]   ;;  %v1970_v6 = vld [vmem:[#allocation5 + $0x30] ss:$12 sps:$4 sm:$0xff]   ;;  %v1971_v7 = vld [vmem:[#allocation5 + $0x4c] ss:$12 sps:$4 sm:$0xff]  }
  0x4d   :  { %328 = vmatpush1.bf16.msra.mxu0 %v1964_v2  ;;  %v1983_v8 = vld [vmem:[#allocation5 + $0x8] ss:$12 sps:$4 sm:$0xff]   ;;  %v1974_v10 = vld [vmem:[#allocation5 + $0x64] ss:$12 sps:$4 sm:$0xff]   ;;  %v1987_v11 = vld [vmem:[#allocation5 + $0x20] ss:$12 sps:$4 sm:$0xff]  }
  0x4e   :  { %329 = vmatprep.subr.bf16.mxu0 %v1965_v3  ;;  %v1973_v9 = vld [vmem:[#allocation5 + $0x48] ss:$12 sps:$4 sm:$0xff]   ;;  %1745 = vmatprep.subr.bf16.mxu1 %v1983_v8  ;;  %v1988_v12 = vld [vmem:[#allocation2] sm:$0xff]   ;;  %v1996_v16 = vld [vmem:[#allocation5 + $0x50] ss:$12 sps:$4 sm:$0xff]   ;;  %v2910_v39 = vmov 0.0  }
  0x4f   :  { %1746 = vmatpush3.bf16.msra.mxu1 %v1983_v8  ;;  %v1976_v13 = vld [vmem:[#allocation5 + $0x60] ss:$12 sps:$4 sm:$0xff]   ;;  %v1992_v14 = vld [vmem:[#allocation5 + $0x38] ss:$12 sps:$4 sm:$0xff]   ;;  %1761 = vmatprep.mubr.bf16.mxu1 %v1988_v12  ;;  %v1977_v15 = vld [vmem:[#allocation5 + $0x7c] ss:$12 sps:$4 sm:$0xff]  }
  0x50   :  { %1747 = vmatprep.subr.bf16.mxu1 %v1987_v11  ;;  %v1979_v17 = vld [vmem:[#allocation5 + $0x78] ss:$12 sps:$4 sm:$0xff]   ;;  %v1980_v18 = vld [vmem:[#allocation5 + $0x94] ss:$12 sps:$4 sm:$0xff]   ;;  %v1982_v20 = vld [vmem:[#allocation5 + $0x90] ss:$12 sps:$4 sm:$0xff]  }
  0x51   :  { %330 = vmatpush1.bf16.msra.mxu0 %v1967_v4  ;;  %v2001_v19 = vld [vmem:[#allocation5 + $0x68] ss:$12 sps:$4 sm:$0xff]   ;;  %v1984_v21 = vld [vmem:[#allocation5 + $0xac] ss:$12 sps:$4 sm:$0xff]   ;;  %v2386_v24 = vld [vmem:[#allocation7 + $0x4] ss:$12 sps:$4 sm:$0xff]  }
  0x52   :  { %331 = vmatprep.subr.bf16.mxu0 %v1968_v5  ;;  %v2005_v22 = vld [vmem:[#allocation5 + $0x80] ss:$12 sps:$4 sm:$0xff]   ;;  %v1986_v23 = vld [vmem:[#allocation5 + $0xa8] ss:$12 sps:$4 sm:$0xff]   ;;  %v2010_v25 = vld [vmem:[#allocation5 + $0x98] ss:$12 sps:$4 sm:$0xff]  }
  0x53   :  { %1748 = vmatpush3.bf16.msra.mxu1 %v1987_v11  ;;  %v2388_v26 = vld [vmem:[#allocation7] ss:$12 sps:$4 sm:$0xff]   ;;  %v2391_v27 = vld [vmem:[#allocation7 + $0x1c] ss:$12 sps:$4 sm:$0xff]   ;;  %v2394_v29 = vld [vmem:[#allocation7 + $0x18] ss:$12 sps:$4 sm:$0xff]  }
  0x54   :  { %1749 = vmatprep.subr.bf16.mxu1 %v1992_v14  ;;  %v2014_v28 = vld [vmem:[#allocation5 + $0xb0] ss:$12 sps:$4 sm:$0xff]   ;;  %v2398_v30 = vld [vmem:[#allocation7 + $0x34] ss:$12 sps:$4 sm:$0xff]   ;;  %v2404_v33 = vld [vmem:[#allocation7 + $0x4c] ss:$12 sps:$4 sm:$0xff]  }
  0x55   :  { %332 = vmatpush1.bf16.msra.mxu0 %v1970_v6  ;;  %v2401_v32 = vld [vmem:[#allocation7 + $0x30] ss:$12 sps:$4 sm:$0xff]   ;;  %v2406_v34 = vld [vmem:[#allocation7 + $0x48] ss:$12 sps:$4 sm:$0xff]   ;;  %v482_v37 = vld [vmem:[%s2900_s1] sm:$0xff]  ;;  %vm2270_vm0 = vmmov 0  }
  0x56   :  { %333 = vmatprep.subr.bf16.mxu0 %v1971_v7  ;;  %v2006_v35 = vld [vmem:[#allocation2 + $0x10] sm:$0xff]   ;;  %v2418_v40 = vld [vmem:[#allocation7 + $0x20] ss:$12 sps:$4 sm:$0xff]   ;;  %484 = vperm.xlu0 %1961, %v482_v37   ;;  %v2427_v42 = vld [vmem:[#allocation7 + $0x7c] ss:$12 sps:$4 sm:$0xff]   ;;  %v2514_v56 = vshrl.u32 %v160_v55, 7 }
  0x57   :  { %1750 = vmatpush3.bf16.msra.mxu1 %v1992_v14  ;;  %v2408_v36 = vld [vmem:[#allocation7 + $0x8] ss:$12 sps:$4 sm:$0xff]   ;;  %v2413_v38 = vld [vmem:[#allocation7 + $0x64] ss:$12 sps:$4 sm:$0xff]   ;;  %v2424_v41 = vld [vmem:[#allocation7 + $0x60] ss:$12 sps:$4 sm:$0xff]  }
  0x58   :  { %1751 = vmatprep.subr.bf16.mxu1 %v1996_v16  ;;  %v2430_v43 = vld [vmem:[#allocation7 + $0x38] ss:$12 sps:$4 sm:$0xff]   ;;  %v2438_v46 = vld [vmem:[#allocation7 + $0x94] ss:$12 sps:$4 sm:$0xff]   ;;  %v2441_v47 = vld [vmem:[#allocation7 + $0x50] ss:$12 sps:$4 sm:$0xff]  }
  0x59   :  { %334 = vmatpush1.bf16.msra.mxu0 %v1973_v9  ;;  %v2015_v44 = vld [vmem:[#allocation2 + $0x18] sm:$0xff]   ;;  %v2453_v50 = vld [vmem:[#allocation7 + $0x68] ss:$12 sps:$4 sm:$0xff]   ;;  %v2462_v52 = vld [vmem:[#allocation7 + $0x80] ss:$12 sps:$4 sm:$0xff]   ;;  %v162_v57 = vsub.s32 0, %v2514_v56 }
  0x5a   :  { %335 = vmatprep.subr.bf16.mxu0 %v1974_v10  ;;  %v2434_v45 = vld [vmem:[#allocation7 + $0x78] ss:$12 sps:$4 sm:$0xff]   ;;  %v2447_v48 = vld [vmem:[#allocation7 + $0x90] ss:$12 sps:$4 sm:$0xff]   ;;  %v2457_v51 = vld [vmem:[#allocation7 + $0xa8] ss:$12 sps:$4 sm:$0xff]  }
  0x5b   :  { %1752 = vmatpush3.bf16.msra.mxu1 %v1996_v16  ;;  %v2450_v49 = vld [vmem:[#allocation7 + $0xac] ss:$12 sps:$4 sm:$0xff]   ;;  %v2476_v54 = vld [vmem:[#allocation7 + $0xb0] ss:$12 sps:$4 sm:$0xff]   ;;  %v158_v58 = vld [vmem:[%s2903_s4] sm:$0x7] }
  0x5c   :  { %1753 = vmatprep.subr.bf16.mxu1 %v2001_v19  ;;  %v2468_v53 = vld [vmem:[#allocation7 + $0x98] ss:$12 sps:$4 sm:$0xff]   ;;  %v166_v59 = vsub.s32 1, %v2514_v56  ;;  %v163_v61 = vrot.slane %v158_v58, %v162_v57  ;;  %v2912_v4 = vsub.s32 2, %v2514_v56  ;;  %s2271_s13 = smov [#allocation10]  }
  0x5d   :  { %336 = vmatpush1.bf16.msra.mxu0 %v1976_v13  ;;  %s1564_s14 = sshll.u32 %s2271_s13, 4  ;;  %s1565_s14 = int_to_ptr.vmem [resolvable:$true] %s1564_s14 }
  0x5e   :  { %337 = vmatprep.subr.bf16.mxu0 %v1977_v15  ;;  %v167_v63 = vrot.slane %v158_v58, %v166_v59  ;;  %v2528_v6 = vrot.slane %v158_v58, %v2912_v4  ;;  %s2230_s17 = scalar_lea.vmem %s1565_s14, 128  ;;  %p2235_p5 = scmp.lt.s32.totalorder %s1565_s14, %s1565_s14 }
  0x5f   :  { %1754 = vmatpush3.bf16.msra.mxu1 %v2001_v19  ;;  %p2231_p4 = scmp.ne.s32.totalorder %s1565_s14, %s2230_s17  ;;  %p2236_p6 = scmp.lt.s32.totalorder %s2230_s17, %s2230_s17 }
  0x60   :  { %1755 = vmatprep.subr.bf16.mxu1 %v2005_v22 }
  0x61   :  { %338 = vmatpush1.bf16.msra.mxu0 %v1979_v17  ;;  %p2237_p7 = por %p2236_p6, %p2235_p5 }
  0x62   :  { %339 = vmatprep.subr.bf16.mxu0 %v1980_v18 }
  0x63   :  { %1756 = vmatpush3.bf16.msra.mxu1 %v2005_v22  ;;  %p2238_p8 = pnand %p2237_p7, %p2231_p4 }
  0x64   :  { %1757 = vmatprep.subr.bf16.mxu1 %v2010_v25 }
  0x65   :  { %340 = vmatpush1.bf16.msra.mxu0 %v1982_v20 }
  0x66   :  { %341 = vmatprep.subr.bf16.mxu0 %v1984_v21 }
  0x67   :  { %1758 = vmatpush3.bf16.msra.mxu1 %v2010_v25 }
  0x68   :  { %1759 = vmatprep.subr.bf16.mxu1 %v2014_v28 }
  0x69   :  { %342 = vmatpush1.bf16.msra.mxu0 %v1986_v23 }
  0x6a   :  { %614 = vmatprep.subr.bf16.mxu0 %v2386_v24 }
  0x6b   :  { %1760 = vmatpush3.bf16.msra.mxu1 %v2014_v28 }
  0x6c   :  { %360 = vmatmul.mubr.bf16.vlgmr.msra.gmra.mrb[0].mxu0 %v1988_v12  ;;  %1769 = vmatprep.subr.bf16.mxu1 %v2910_v39 }
  0x6d   :  { %615 = vmatpush1.bf16.msra.mxu0 %v2388_v26  ;;  %369 = vmatprep.mubr.bf16.mxu0 %v2908_v0 }
  0x6e   :  { %616 = vmatprep.subr.bf16.mxu0 %v2391_v27  ;;  %1762 = vmatmul.mubr.bf16.vlgmr.msra.gmra.mrb[0].mxu1 %v1997_v31 }
  0x6f   :  { %1770 = vmatpush3.bf16.msra.mxu1 %v2408_v36  ;;  %1765 = vmatprep.mubr.bf16.mxu1 %v2006_v35 }
  0x70   :  { %1771 = vmatprep.subr.bf16.mxu1 %v2910_v39 }
  0x71   :  { %617 = vmatpush1.bf16.msra.mxu0 %v2394_v29 }
  0x72   :  { %618 = vmatprep.subr.bf16.mxu0 %v2398_v30 }
  0x73   :  { %1772 = vmatpush3.bf16.msra.mxu1 %v2418_v40 }
  0x74   :  { %370 = vmatmul.mubr.bf16.gmra.mrb[4].mxu0 %v1997_v31  ;;  %1773 = vmatprep.subr.bf16.mxu1 %v2910_v39 }
  0x75   :  { %619 = vmatpush1.bf16.msra.mxu0 %v2401_v32  ;;  %379 = vmatprep.mubr.bf16.mxu0 %v2908_v0 }
  0x76   :  { %620 = vmatprep.subr.bf16.mxu0 %v2404_v33  ;;  %1766 = vmatmul.mubr.bf16.gmra.mrb[4].mxu1 %v2015_v44 }
  0x77   :  { %1774 = vmatpush3.bf16.msra.mxu1 %v2430_v43  ;;  %1785 = vmatprep.mubr.msk.bf16.mxu1 %vm2270_vm0, %v2910_v39 }
  0x78   :  { %1775 = vmatprep.subr.bf16.mxu1 %v2910_v39 }
  0x79   :  { %621 = vmatpush1.bf16.msra.mxu0 %v2406_v34 }
  0x7a   :  { %622 = vmatprep.subr.bf16.mxu0 %v2413_v38 }
  0x7b   :  { %1776 = vmatpush3.bf16.msra.mxu1 %v2441_v47 }
  0x7c   :  { %380 = vmatmul.mubr.bf16.gmra.mrb[8].mxu0 %v2006_v35  ;;  %1777 = vmatprep.subr.bf16.mxu1 %v2910_v39 }
  0x7d   :  { %623 = vmatpush1.bf16.msra.mxu0 %v2424_v41  ;;  %389 = vmatprep.mubr.bf16.mxu0 %v2908_v0 }
  0x7e   :  { %624 = vmatprep.subr.bf16.mxu0 %v2427_v42 }
  0x7f   :  { %1778 = vmatpush3.bf16.msra.mxu1 %v2453_v50 }
  0x80   :  { %1779 = vmatprep.subr.bf16.mxu1 %v2910_v39 }
  0x81   :  { %625 = vmatpush1.bf16.msra.mxu0 %v2434_v45 }
  0x82   :  { %626 = vmatprep.subr.bf16.mxu0 %v2438_v46 }
  0x83   :  { %1780 = vmatpush3.bf16.msra.mxu1 %v2462_v52 }
  0x84   :  { %390 = vmatmul.mubr.bf16.gmra.mrb[12].mxu0 %v2015_v44  ;;  %1781 = vmatprep.subr.bf16.mxu1 %v2910_v39 }
  0x85   :  { %627 = vmatpush1.bf16.msra.mxu0 %v2447_v48  ;;  %646 = vmatprep.mubr.bf16.mxu0 %v2908_v0 }
  0x86   :  { %628 = vmatprep.subr.bf16.mxu0 %v2450_v49 }
  0x87   :  { %1782 = vmatpush3.bf16.msra.mxu1 %v2468_v53 }
  0x88   :  { %1783 = vmatprep.subr.bf16.mxu1 %v2910_v39 }
  0x89   :  { %629 = vmatpush1.bf16.msra.mxu0 %v2457_v51 }
  0x8a   :  { %718 = vmatprep.subr.bf16.mxu0 %v2386_v24 }
  0x8b   :  { %1784 = vmatpush3.bf16.msra.mxu1 %v2476_v54 }
  0x8c   :  { %647 = vmatmul.mubr.bf16.vlgmr.msra.gmra.mrb[16].mxu0 %v2908_v0  ;;  %1789 = vmatprep.subr.bf16.mxu1 %v2910_v39 }
  0x8d   :  { %719 = vmatpush1.bf16.msra.mxu0 %v2388_v26  ;;  %750 = vmatprep.mubr.bf16.mxu0 %v2908_v0 }
  0x8e   :  { %720 = vmatprep.subr.bf16.mxu0 %v2391_v27  ;;  %1786 = vmatmul.mubr.bf16.vlgmr.msra.gmra.mrb[8].mxu1 %v2908_v0 }
  0x8f   :  { %1790 = vmatpush3.bf16.msra.mxu1 %v2408_v36  ;;  %1805 = vmatprep.mubr.msk.bf16.mxu1 %vm2270_vm0, %v2910_v39 }
  0x90   :  { %1791 = vmatprep.subr.bf16.mxu1 %v2910_v39 }
  0x91   :  { %721 = vmatpush1.bf16.msra.mxu0 %v2394_v29 }
  0x92   :  { %722 = vmatprep.subr.bf16.mxu0 %v2398_v30 }
  0x93   :  { %1792 = vmatpush3.bf16.msra.mxu1 %v2418_v40 }
  0x94   :  { %1793 = vmatprep.subr.bf16.mxu1 %v2910_v39 }
  0x95   :  { %723 = vmatpush1.bf16.msra.mxu0 %v2401_v32 }
  0x96   :  { %724 = vmatprep.subr.bf16.mxu0 %v2404_v33 }
  0x97   :  { %1794 = vmatpush3.bf16.msra.mxu1 %v2430_v43 }
  0x98   :  { %1795 = vmatprep.subr.bf16.mxu1 %v2910_v39 }
  0x99   :  { %725 = vmatpush1.bf16.msra.mxu0 %v2406_v34 }
  0x9a   :  { %726 = vmatprep.subr.bf16.mxu0 %v2413_v38 }
  0x9b   :  { %1796 = vmatpush3.bf16.msra.mxu1 %v2441_v47 }
  0x9c   :  { %1797 = vmatprep.subr.bf16.mxu1 %v2910_v39 }
  0x9d   :  { %727 = vmatpush1.bf16.msra.mxu0 %v2424_v41 }
  0x9e   :  { %728 = vmatprep.subr.bf16.mxu0 %v2427_v42 }
  0x9f   :  { %1798 = vmatpush3.bf16.msra.mxu1 %v2453_v50 }
  0xa0   :  { %1799 = vmatprep.subr.bf16.mxu1 %v2910_v39 }
  0xa1   :  { %729 = vmatpush1.bf16.msra.mxu0 %v2434_v45 }
  0xa2   :  { %730 = vmatprep.subr.bf16.mxu0 %v2438_v46 }
  0xa3   :  { %1800 = vmatpush3.bf16.msra.mxu1 %v2462_v52 }
  0xa4   :  { %1801 = vmatprep.subr.bf16.mxu1 %v2910_v39 }
  0xa5   :  { %731 = vmatpush1.bf16.msra.mxu0 %v2447_v48 }
  0xa6   :  { %732 = vmatprep.subr.bf16.mxu0 %v2450_v49 }
  0xa7   :  { %1802 = vmatpush3.bf16.msra.mxu1 %v2468_v53 }
  0xa8   :  { %1803 = vmatprep.subr.bf16.mxu1 %v2910_v39 }
  0xa9   :  { %733 = vmatpush1.bf16.msra.mxu0 %v2457_v51 }
  0xaa   :  { %822 = vmatprep.subr.bf16.mxu0 %v2386_v24 }
  0xab   :  { %1804 = vmatpush3.bf16.msra.mxu1 %v2476_v54 }
  0xac   :  { %1809 = vmatprep.subr.bf16.mxu1 %v2910_v39 }
 0x13f   :  { %v361_v60 = vpop.f32.mrb[0].mxu0 }
 0x140   :  { %v363_v62 = vpop.f32.mrb[1].mxu0 }
 0x141   :  { %v365_v1 = vpop.f32.mrb[2].mxu0  ;;  %v1763_v12 = vpop.f32.mrb[0].mxu1  ;;  %v364_v4 = vadd.f32 %v363_v62, %v167_v63 }
 0x142   :  { %v2521_v2 = vadd.f32 %v365_v1, %v163_v61  ;;  %v367_v3 = vpop.f32.mrb[3].mxu0  ;;  %v2537_v15 = vadd.f32 %v1763_v12, %v2528_v6  ;;  %v434_v16 = vpop.f32.mrb[1].mxu1 }
 0x143   :  { %v2524_v5 = vadd.f32 %v367_v3, %v167_v63  ;;  %v1764_v18 = vpop.f32.mrb[2].mxu1 }
 0x144   :  { %v2542_v19 = vadd.f32 %v1764_v18, %v2528_v6  ;;  %v437_v20 = vpop.f32.mrb[3].mxu1 }
 0x145   :  { %v2545_v21 = vadd.f32 %v437_v20, %v2528_v6 }
 0x147   :  { %v371_v7 = vpop.f32.mrb[4].mxu0 }
 0x148   :  { %v2530_v8 = vadd.f32 %v371_v7, %v163_v61  ;;  %v373_v9 = vpop.f32.mrb[5].mxu0 }
 0x149   :  { %v2532_v10 = vadd.f32 %v373_v9, %v167_v63  ;;  %v375_v11 = vpop.f32.mrb[6].mxu0  ;;  %v1767_v35 = vpop.f32.mrb[4].mxu1 }
 0x14a   :  { %v2534_v13 = vadd.f32 %v375_v11, %v163_v61  ;;  %v377_v14 = vpop.f32.mrb[7].mxu0  ;;  %v2554_v55 = vadd.f32 %v1767_v35, %v2528_v6  ;;  %v450_v58 = vpop.f32.mrb[5].mxu1 }
 0x14b   :  { %v2539_v17 = vadd.f32 %v377_v14, %v167_v63  ;;  %v2559_v3 = vadd.f32 %v450_v58, %v2528_v6  ;;  %v1768_v7 = vpop.f32.mrb[6].mxu1 }
 0x14c   :  { %2913 = vst [vmem:[#allocation15_spill] sm:$0xff] %v2554_v55  ;;  %v2562_v9 = vadd.f32 %v1768_v7, %v2528_v6  ;;  %v453_v11 = vpop.f32.mrb[7].mxu1 }
 0x14d   :  { %v2565_v12 = vadd.f32 %v453_v11, %v2528_v6 }
 0x14e   :  { %2915 = vst [vmem:[#allocation17_spill] sm:$0xff] %v2562_v9 }
 0x14f   :  { %v381_v22 = vpop.f32.mrb[8].mxu0  ;;  %2916 = vst [vmem:[#allocation18_spill] sm:$0xff] %v2565_v12 }
 0x150   :  { %v2547_v23 = vadd.f32 %v381_v22, %v163_v61  ;;  %v383_v25 = vpop.f32.mrb[9].mxu0 }
 0x151   :  { %v2549_v28 = vadd.f32 %v383_v25, %v167_v63  ;;  %v385_v31 = vpop.f32.mrb[10].mxu0 }
 0x152   :  { %v2551_v37 = vadd.f32 %v385_v31, %v163_v61  ;;  %v387_v44 = vpop.f32.mrb[11].mxu0  ;;  %v465_v31 = vld [vmem:[%s2904_s5] sm:$0x7] }
 0x153   :  { %v2556_v1 = vadd.f32 %v387_v44, %v167_v63  ;;  %v2578_v7 = vrot.slane %v465_v31, %v162_v57  ;;  %v2580_v11 = vrot.slane %v465_v31, %v166_v59 }
 0x155   :  { %2914 = vst [vmem:[#allocation16_spill] sm:$0xff] %v2556_v1 }
 0x157   :  { %v391_v14 = vpop.f32.mrb[12].mxu0 }
 0x158   :  { %v2567_v18 = vadd.f32 %v391_v14, %v163_v61  ;;  %v393_v20 = vpop.f32.mrb[13].mxu0  ;;  %v362_v14 = vadd.f32 %v361_v60, %v163_v61 }
 0x159   :  { %v2569_v22 = vadd.f32 %v393_v20, %v167_v63  ;;  %v395_v25 = vpop.f32.mrb[14].mxu0 }
 0x15a   :  { %2917 = vst [vmem:[#allocation19_spill] sm:$0xff] %v2567_v18  ;;  %v2574_v35 = vadd.f32 %v395_v25, %v163_v61  ;;  %v397_v44 = vpop.f32.mrb[15].mxu0 }
 0x15b   :  { %2918 = vst [vmem:[#allocation20_spill] sm:$0xff] %v2569_v22  ;;  %v2576_v58 = vadd.f32 %v397_v44, %v167_v63 }
 0x15c   :  { %2919 = vst [vmem:[#allocation21_spill] sm:$0xff] %v2574_v35 }
 0x15d   :  { %2920 = vst [vmem:[#allocation22_spill] sm:$0xff] %v2576_v58 }
 0x15f   :  { %v648_v0 = vpop.f32.mrb[16].mxu0 }
 0x160   :  { %v649_v39 = vadd.f32 %v648_v0, %v2578_v7  ;;  %v650_v20 = vpop.f32.mrb[17].mxu0  ;;  %v2921_v0 = vsub.s32 2, %v2514_v56 }
 0x161   :  { %v651_v9 = vadd.f32 %v650_v20, %v2580_v11  ;;  %v652_v55 = vpop.f32.mrb[18].mxu0  ;;  %v689_v44 = vpop.f32.mrb[8].mxu1 }
 0x162   :  { %v695_v22 = vadd.f32 %v649_v39, %v362_v14  ;;  %v653_v18 = vpop.f32.mrb[19].mxu0  ;;  %v1787_v58 = vpop.f32.mrb[9].mxu1  ;;  %v2586_v61 = vrot.slane %v465_v31, %v2921_v0  ;;  %v435_v55 = vadd.f32 %v434_v16, %v2528_v6  ;;  %v2922_v6 = vmov 0.0  }
 0x163   :  { %v702_v25 = vadd.f32 %v651_v9, %v364_v4  ;;  %v692_v57 = vpop.f32.mrb[10].mxu1  ;;  %v2923_v16 = vmov 0  }
 0x164   :  { %v1627_v35 = vmul.f32 -1.442695, %v695_v22  ;;  %v1788_v59 = vpop.f32.mrb[11].mxu1  ;;  %v690_v39 = vadd.f32 %v689_v44, %v2586_v61  ;;  %v2590_v22 = vpop.permute.xlu0 %484 }
 0x165   :  { %v1628_v12 = vmul.f32 -1.442695, %v702_v25  ;;  %vm712_vm1 = vcmp.gt.s32.totalorder %v2590_v22, 0  ;;  %vm816_vm2 = vcmp.gt.s32.totalorder %v2590_v22, 1  ;;  %vm920_vm3 = vcmp.gt.s32.totalorder %v2590_v22, 2 }
 0x166   :  { %2038 = vpow2.f32 %v1627_v35  ;;  %vm1024_vm4 = vcmp.gt.s32.totalorder %v2590_v22, 3  ;;  %vm1128_vm5 = vcmp.gt.s32.totalorder %v2590_v22, 4  ;;  %vm1232_vm6 = vcmp.gt.s32.totalorder %v2590_v22, 5 }
 0x167   :  { %2040 = vpow2.f32 %v1628_v12  ;;  %vm1336_vm7 = vcmp.gt.s32.totalorder %v2590_v22, 6  ;;  %vm1440_vm8 = vcmp.gt.s32.totalorder %v2590_v22, 7 }
 0x170   :  { %v2039_v1 = vpop.eup %2038 }
 0x171   :  { %v699_v60 = vadd.f32 1.0, %v2039_v1  ;;  %v2041_v62 = vpop.eup %2040 }
 0x172   :  { %v706_v4 = vadd.f32 1.0, %v2041_v62 }
 0x173   :  { %2042 = vrcp.f32 %v699_v60 }
 0x174   :  { %2044 = vrcp.f32 %v706_v4 }
 0x17d   :  { %v2043_v63 = vpop.eup %2042 }
 0x17e   :  { %v709_v9 = vmul.f32 %v2043_v63, %v690_v39  ;;  %v2045_v12 = vpop.eup %2044 }
 0x17f   :  { %v713_v31 = vsel %vm712_vm1, %v2045_v12, 1.0 }
 0x180   :  { %v710_v18 = vadd.f32 %v709_v9, %v435_v55 }
 0x182   :  { %2046 = vtanh.f32 %v710_v18 }
 0x18c   :  { %v2047_v1 = vpop.eup %2046 }
 0x18d   :  { %v714_v56 = vsub.f32 0.0, %v2047_v1 }
 0x18f   :  { %v715_v35 = vmul.f32 %v714_v56, %v713_v31 }
 0x191   :  { %v2593_v58 = vadd.f32 %v2047_v1, %v715_v35 }
 0x193   :  { %v717_v14 = vpack.c.bf16 %v2593_v58, %v2593_v58 }
 0x195   :  { %751 = vmatmul.mubr.bf16.vlgmr.msra.gmra.mrb[20].mxu0 %v717_v14  ;;  %1806 = vmatmul.mubr.bf16.vlgmr.msra.gmra.mrb[12].mxu1 %v717_v14 }
 0x196   :  { %823 = vmatpush1.bf16.msra.mxu0 %v2388_v26  ;;  %1810 = vmatpush3.bf16.msra.mxu1 %v2408_v36 }
 0x197   :  { %824 = vmatprep.subr.bf16.mxu0 %v2391_v27  ;;  %1811 = vmatprep.subr.bf16.mxu1 %v2922_v6 }
 0x198   :  { %854 = vmatprep.mubr.bf16.mxu0 %v2923_v16  ;;  %1825 = vmatprep.mubr.msk.bf16.mxu1 %vm2270_vm0, %v2922_v6 }
 0x19a   :  { %825 = vmatpush1.bf16.msra.mxu0 %v2394_v29  ;;  %1812 = vmatpush3.bf16.msra.mxu1 %v2418_v40 }
 0x19b   :  { %826 = vmatprep.subr.bf16.mxu0 %v2398_v30  ;;  %1813 = vmatprep.subr.bf16.mxu1 %v2922_v6 }
 0x19e   :  { %827 = vmatpush1.bf16.msra.mxu0 %v2401_v32  ;;  %1814 = vmatpush3.bf16.msra.mxu1 %v2430_v43 }
 0x19f   :  { %828 = vmatprep.subr.bf16.mxu0 %v2404_v33  ;;  %1815 = vmatprep.subr.bf16.mxu1 %v2922_v6 }
 0x1a2   :  { %829 = vmatpush1.bf16.msra.mxu0 %v2406_v34  ;;  %1816 = vmatpush3.bf16.msra.mxu1 %v2441_v47 }
 0x1a3   :  { %830 = vmatprep.subr.bf16.mxu0 %v2413_v38  ;;  %1817 = vmatprep.subr.bf16.mxu1 %v2922_v6 }
 0x1a6   :  { %831 = vmatpush1.bf16.msra.mxu0 %v2424_v41  ;;  %1818 = vmatpush3.bf16.msra.mxu1 %v2453_v50 }
 0x1a7   :  { %832 = vmatprep.subr.bf16.mxu0 %v2427_v42  ;;  %1819 = vmatprep.subr.bf16.mxu1 %v2922_v6 }
 0x1aa   :  { %833 = vmatpush1.bf16.msra.mxu0 %v2434_v45  ;;  %1820 = vmatpush3.bf16.msra.mxu1 %v2462_v52 }
 0x1ab   :  { %834 = vmatprep.subr.bf16.mxu0 %v2438_v46  ;;  %1821 = vmatprep.subr.bf16.mxu1 %v2922_v6 }
 0x1ae   :  { %835 = vmatpush1.bf16.msra.mxu0 %v2447_v48  ;;  %1822 = vmatpush3.bf16.msra.mxu1 %v2468_v53 }
 0x1af   :  { %836 = vmatprep.subr.bf16.mxu0 %v2450_v49  ;;  %1823 = vmatprep.subr.bf16.mxu1 %v2922_v6 }
 0x1b2   :  { %837 = vmatpush1.bf16.msra.mxu0 %v2457_v51  ;;  %1824 = vmatpush3.bf16.msra.mxu1 %v2476_v54 }
 0x1b3   :  { %926 = vmatprep.subr.bf16.mxu0 %v2386_v24  ;;  %1829 = vmatprep.subr.bf16.mxu1 %v2922_v6 }
 0x268   :  { %v752_v20 = vpop.f32.mrb[20].mxu0  ;;  %v793_v25 = vpop.f32.mrb[12].mxu1 }
 0x269   :  { %v753_v44 = vadd.f32 %v752_v20, %v2578_v7  ;;  %v754_v57 = vpop.f32.mrb[21].mxu0  ;;  %v1807_v59 = vpop.f32.mrb[13].mxu1  ;;  %v794_v35 = vadd.f32 %v793_v25, %v2586_v61 }
 0x26a   :  { %v755_v60 = vadd.f32 %v754_v57, %v2580_v11  ;;  %v756_v0 = vpop.f32.mrb[22].mxu0  ;;  %v796_v62 = vpop.f32.mrb[14].mxu1 }
 0x26b   :  { %v799_v39 = vadd.f32 %v753_v44, %v2521_v2  ;;  %v757_v63 = vpop.f32.mrb[23].mxu0  ;;  %v1808_v4 = vpop.f32.mrb[15].mxu1 }
 0x26c   :  { %v806_v55 = vadd.f32 %v755_v60, %v2524_v5 }
 0x26d   :  { %v1629_v9 = vmul.f32 -1.442695, %v799_v39 }
 0x26e   :  { %v1630_v18 = vmul.f32 -1.442695, %v806_v55 }
 0x26f   :  { %2048 = vpow2.f32 %v1629_v9 }
 0x270   :  { %2050 = vpow2.f32 %v1630_v18 }
 0x279   :  { %v2049_v12 = vpop.eup %2048 }
 0x27a   :  { %v2051_v1 = vpop.eup %2050  ;;  %v803_v56 = vadd.f32 1.0, %v2049_v12 }
 0x27b   :  { %v810_v31 = vadd.f32 1.0, %v2051_v1 }
 0x27c   :  { %2052 = vrcp.f32 %v803_v56 }
 0x27d   :  { %2054 = vrcp.f32 %v810_v31 }
 0x286   :  { %v2053_v14 = vpop.eup %2052 }
 0x287   :  { %v2055_v20 = vpop.eup %2054  ;;  %v813_v57 = vmul.f32 %v2053_v14, %v794_v35 }
 0x288   :  { %v817_v2 = vsel %vm816_vm2, %v2055_v20, 1.0 }
 0x289   :  { %v814_v5 = vadd.f32 %v813_v57, %v2545_v21 }
 0x28b   :  { %2056 = vtanh.f32 %v814_v5 }
 0x295   :  { %v2057_v44 = vpop.eup %2056 }
 0x296   :  { %v818_v59 = vsub.f32 %v2593_v58, %v2057_v44 }
 0x298   :  { %v819_v60 = vmul.f32 %v818_v59, %v817_v2 }
 0x29a   :  { %v2640_v0 = vadd.f32 %v2057_v44, %v819_v60 }
 0x29c   :  { %v821_v62 = vpack.c.bf16 %v2640_v0, %v2640_v0 }
 0x29e   :  { %855 = vmatmul.mubr.bf16.vlgmr.msra.gmra.mrb[24].mxu0 %v821_v62  ;;  %1826 = vmatmul.mubr.bf16.vlgmr.msra.gmra.mrb[16].mxu1 %v821_v62 }
 0x29f   :  { %927 = vmatpush1.bf16.msra.mxu0 %v2388_v26  ;;  %1830 = vmatpush3.bf16.msra.mxu1 %v2408_v36 }
 0x2a0   :  { %928 = vmatprep.subr.bf16.mxu0 %v2391_v27  ;;  %1831 = vmatprep.subr.bf16.mxu1 %v2922_v6 }
 0x2a1   :  { %958 = vmatprep.mubr.bf16.mxu0 %v2923_v16  ;;  %1845 = vmatprep.mubr.msk.bf16.mxu1 %vm2270_vm0, %v2922_v6 }
 0x2a3   :  { %929 = vmatpush1.bf16.msra.mxu0 %v2394_v29  ;;  %1832 = vmatpush3.bf16.msra.mxu1 %v2418_v40 }
 0x2a4   :  { %930 = vmatprep.subr.bf16.mxu0 %v2398_v30  ;;  %1833 = vmatprep.subr.bf16.mxu1 %v2922_v6 }
 0x2a7   :  { %931 = vmatpush1.bf16.msra.mxu0 %v2401_v32  ;;  %1834 = vmatpush3.bf16.msra.mxu1 %v2430_v43 }
 0x2a8   :  { %932 = vmatprep.subr.bf16.mxu0 %v2404_v33  ;;  %1835 = vmatprep.subr.bf16.mxu1 %v2922_v6 }
 0x2ab   :  { %933 = vmatpush1.bf16.msra.mxu0 %v2406_v34  ;;  %1836 = vmatpush3.bf16.msra.mxu1 %v2441_v47 }
 0x2ac   :  { %934 = vmatprep.subr.bf16.mxu0 %v2413_v38  ;;  %1837 = vmatprep.subr.bf16.mxu1 %v2922_v6 }
 0x2af   :  { %935 = vmatpush1.bf16.msra.mxu0 %v2424_v41  ;;  %1838 = vmatpush3.bf16.msra.mxu1 %v2453_v50 }
 0x2b0   :  { %936 = vmatprep.subr.bf16.mxu0 %v2427_v42  ;;  %1839 = vmatprep.subr.bf16.mxu1 %v2922_v6 }
 0x2b3   :  { %937 = vmatpush1.bf16.msra.mxu0 %v2434_v45  ;;  %1840 = vmatpush3.bf16.msra.mxu1 %v2462_v52 }
 0x2b4   :  { %938 = vmatprep.subr.bf16.mxu0 %v2438_v46  ;;  %1841 = vmatprep.subr.bf16.mxu1 %v2922_v6 }
 0x2b7   :  { %939 = vmatpush1.bf16.msra.mxu0 %v2447_v48  ;;  %1842 = vmatpush3.bf16.msra.mxu1 %v2468_v53 }
 0x2b8   :  { %940 = vmatprep.subr.bf16.mxu0 %v2450_v49  ;;  %1843 = vmatprep.subr.bf16.mxu1 %v2922_v6 }
 0x2bb   :  { %941 = vmatpush1.bf16.msra.mxu0 %v2457_v51  ;;  %1844 = vmatpush3.bf16.msra.mxu1 %v2476_v54 }
 0x2bc   :  { %1030 = vmatprep.subr.bf16.mxu0 %v2386_v24  ;;  %1849 = vmatprep.subr.bf16.mxu1 %v2922_v6 }
 0x371   :  { %v856_v21 = vpop.f32.mrb[24].mxu0  ;;  %v897_v58 = vpop.f32.mrb[16].mxu1 }
 0x372   :  { %v857_v25 = vadd.f32 %v856_v21, %v2578_v7  ;;  %v858_v39 = vpop.f32.mrb[25].mxu0  ;;  %v1827_v63 = vpop.f32.mrb[17].mxu1  ;;  %v898_v5 = vadd.f32 %v897_v58, %v2586_v61 }
 0x373   :  { %v859_v4 = vadd.f32 %v858_v39, %v2580_v11  ;;  %v860_v55 = vpop.f32.mrb[26].mxu0  ;;  %v900_v9 = vpop.f32.mrb[18].mxu1 }
 0x374   :  { %v903_v18 = vadd.f32 %v857_v25, %v2530_v8  ;;  %v861_v12 = vpop.f32.mrb[27].mxu0  ;;  %v1828_v1 = vpop.f32.mrb[19].mxu1 }
 0x375   :  { %v910_v56 = vadd.f32 %v859_v4, %v2532_v10 }
 0x376   :  { %v1631_v31 = vmul.f32 -1.442695, %v903_v18 }
 0x377   :  { %v1632_v35 = vmul.f32 -1.442695, %v910_v56 }
 0x378   :  { %2058 = vpow2.f32 %v1631_v31 }
 0x379   :  { %2060 = vpow2.f32 %v1632_v35 }
 0x382   :  { %v2059_v14 = vpop.eup %2058 }
 0x383   :  { %v2061_v20 = vpop.eup %2060  ;;  %v907_v57 = vadd.f32 1.0, %v2059_v14 }
 0x384   :  { %v914_v2 = vadd.f32 1.0, %v2061_v20 }
 0x385   :  { %2062 = vrcp.f32 %v907_v57 }
 0x386   :  { %2064 = vrcp.f32 %v914_v2 }
 0x38f   :  { %v2063_v44 = vpop.eup %2062 }
 0x390   :  { %v2065_v59 = vpop.eup %2064  ;;  %v917_v60 = vmul.f32 %v2063_v44, %v898_v5 }
 0x391   :  { %v921_v8 = vsel %vm920_vm3, %v2065_v59, 1.0 }
 0x392   :  { %v918_v10 = vadd.f32 %v917_v60, %v2537_v15 }
 0x394   :  { %2066 = vtanh.f32 %v918_v10 }
 0x39e   :  { %v2067_v62 = vpop.eup %2066 }
 0x39f   :  { %v922_v21 = vsub.f32 %v2640_v0, %v2067_v62 }
 0x3a1   :  { %v923_v25 = vmul.f32 %v922_v21, %v921_v8 }
 0x3a3   :  { %v2687_v39 = vadd.f32 %v2067_v62, %v923_v25 }
 0x3a5   :  { %v925_v63 = vpack.c.bf16 %v2687_v39, %v2687_v39 }
 0x3a7   :  { %959 = vmatmul.mubr.bf16.vlgmr.msra.gmra.mrb[28].mxu0 %v925_v63  ;;  %1846 = vmatmul.mubr.bf16.vlgmr.msra.gmra.mrb[20].mxu1 %v925_v63 }
 0x3a8   :  { %1031 = vmatpush1.bf16.msra.mxu0 %v2388_v26  ;;  %1850 = vmatpush3.bf16.msra.mxu1 %v2408_v36 }
 0x3a9   :  { %1032 = vmatprep.subr.bf16.mxu0 %v2391_v27  ;;  %1851 = vmatprep.subr.bf16.mxu1 %v2922_v6 }
 0x3aa   :  { %1062 = vmatprep.mubr.bf16.mxu0 %v2923_v16  ;;  %1865 = vmatprep.mubr.msk.bf16.mxu1 %vm2270_vm0, %v2922_v6 }
 0x3ac   :  { %1033 = vmatpush1.bf16.msra.mxu0 %v2394_v29  ;;  %1852 = vmatpush3.bf16.msra.mxu1 %v2418_v40 }
 0x3ad   :  { %1034 = vmatprep.subr.bf16.mxu0 %v2398_v30  ;;  %1853 = vmatprep.subr.bf16.mxu1 %v2922_v6 }
 0x3b0   :  { %1035 = vmatpush1.bf16.msra.mxu0 %v2401_v32  ;;  %1854 = vmatpush3.bf16.msra.mxu1 %v2430_v43 }
 0x3b1   :  { %1036 = vmatprep.subr.bf16.mxu0 %v2404_v33  ;;  %1855 = vmatprep.subr.bf16.mxu1 %v2922_v6 }
 0x3b4   :  { %1037 = vmatpush1.bf16.msra.mxu0 %v2406_v34  ;;  %1856 = vmatpush3.bf16.msra.mxu1 %v2441_v47 }
 0x3b5   :  { %1038 = vmatprep.subr.bf16.mxu0 %v2413_v38  ;;  %1857 = vmatprep.subr.bf16.mxu1 %v2922_v6 }
 0x3b8   :  { %1039 = vmatpush1.bf16.msra.mxu0 %v2424_v41  ;;  %1858 = vmatpush3.bf16.msra.mxu1 %v2453_v50 }
 0x3b9   :  { %1040 = vmatprep.subr.bf16.mxu0 %v2427_v42  ;;  %1859 = vmatprep.subr.bf16.mxu1 %v2922_v6 }
 0x3bc   :  { %1041 = vmatpush1.bf16.msra.mxu0 %v2434_v45  ;;  %1860 = vmatpush3.bf16.msra.mxu1 %v2462_v52 }
 0x3bd   :  { %1042 = vmatprep.subr.bf16.mxu0 %v2438_v46  ;;  %1861 = vmatprep.subr.bf16.mxu1 %v2922_v6 }
 0x3c0   :  { %1043 = vmatpush1.bf16.msra.mxu0 %v2447_v48  ;;  %1862 = vmatpush3.bf16.msra.mxu1 %v2468_v53 }
 0x3c1   :  { %1044 = vmatprep.subr.bf16.mxu0 %v2450_v49  ;;  %1863 = vmatprep.subr.bf16.mxu1 %v2922_v6 }
 0x3c4   :  { %1045 = vmatpush1.bf16.msra.mxu0 %v2457_v51  ;;  %1864 = vmatpush3.bf16.msra.mxu1 %v2476_v54 }
 0x3c5   :  { %1134 = vmatprep.subr.bf16.mxu0 %v2386_v24  ;;  %1869 = vmatprep.subr.bf16.mxu1 %v2922_v6 }
 0x47a   :  { %v960_v15 = vpop.f32.mrb[28].mxu0  ;;  %v1001_v0 = vpop.f32.mrb[20].mxu1 }
 0x47b   :  { %v961_v58 = vadd.f32 %v960_v15, %v2578_v7  ;;  %v962_v4 = vpop.f32.mrb[29].mxu0  ;;  %v1847_v55 = vpop.f32.mrb[21].mxu1  ;;  %v1002_v59 = vadd.f32 %v1001_v0, %v2586_v61 }
 0x47c   :  { %v963_v9 = vadd.f32 %v962_v4, %v2580_v11  ;;  %v964_v18 = vpop.f32.mrb[30].mxu0  ;;  %v1004_v12 = vpop.f32.mrb[22].mxu1 }
 0x47d   :  { %v1007_v1 = vadd.f32 %v961_v58, %v2534_v13  ;;  %v965_v56 = vpop.f32.mrb[31].mxu0  ;;  %v1848_v31 = vpop.f32.mrb[23].mxu1 }
 0x47e   :  { %v1014_v35 = vadd.f32 %v963_v9, %v2539_v17 }
 0x47f   :  { %v1633_v14 = vmul.f32 -1.442695, %v1007_v1 }
 0x480   :  { %v1634_v20 = vmul.f32 -1.442695, %v1014_v35 }
 0x481   :  { %2068 = vpow2.f32 %v1633_v14 }
 0x482   :  { %2070 = vpow2.f32 %v1634_v20 }
 0x48b   :  { %v2069_v57 = vpop.eup %2068 }
 0x48c   :  { %v2071_v2 = vpop.eup %2070  ;;  %v1011_v5 = vadd.f32 1.0, %v2069_v57 }
 0x48d   :  { %v1018_v44 = vadd.f32 1.0, %v2071_v2 }
 0x48e   :  { %2072 = vrcp.f32 %v1011_v5 }
 0x48f   :  { %2074 = vrcp.f32 %v1018_v44 }
 0x498   :  { %v2073_v60 = vpop.eup %2072 }
 0x499   :  { %v2075_v8 = vpop.eup %2074  ;;  %v1021_v10 = vmul.f32 %v2073_v60, %v1002_v59  ;;  %v2785_v60 = vld [vmem:[#allocation7] ss:$12 sps:$4 sm:$0xff]  }
 0x49a   :  { %v1025_v13 = vsel %vm1024_vm4, %v2075_v8, 1.0  ;;  %v2789_v8 = vld [vmem:[#allocation7 + $0x1c] ss:$12 sps:$4 sm:$0xff]  }
 0x49b   :  { %v1022_v17 = vadd.f32 %v1021_v10, %v2542_v19  ;;  %v2800_v10 = vld [vmem:[#allocation7 + $0x34] ss:$12 sps:$4 sm:$0xff]  }
 0x49d   :  { %2076 = vtanh.f32 %v1022_v17 }
 0x4a7   :  { %v2077_v62 = vpop.eup %2076 }
 0x4a8   :  { %v1026_v21 = vsub.f32 %v2687_v39, %v2077_v62 }
 0x4aa   :  { %v1027_v25 = vmul.f32 %v1026_v21, %v1025_v13  ;;  %v2808_v13 = vld [vmem:[#allocation7 + $0x4c] ss:$12 sps:$4 sm:$0xff]  }
 0x4ac   :  { %v2734_v63 = vadd.f32 %v2077_v62, %v1027_v25 }
 0x4ae   :  { %v1029_v15 = vpack.c.bf16 %v2734_v63, %v2734_v63 }
 0x4b0   :  { %1063 = vmatmul.mubr.bf16.vlgmr.msra.gmra.mrb[32].mxu0 %v1029_v15  ;;  %1866 = vmatmul.mubr.bf16.vlgmr.msra.gmra.mrb[24].mxu1 %v1029_v15 }
 0x4b1   :  { %1135 = vmatpush1.bf16.msra.mxu0 %v2388_v26  ;;  %1870 = vmatpush3.bf16.msra.mxu1 %v2408_v36 }
 0x4b2   :  { %1136 = vmatprep.subr.bf16.mxu0 %v2391_v27  ;;  %1871 = vmatprep.subr.bf16.mxu1 %v2922_v6 }
 0x4b3   :  { %1166 = vmatprep.mubr.bf16.mxu0 %v2923_v16  ;;  %1885 = vmatprep.mubr.msk.bf16.mxu1 %vm2270_vm0, %v2922_v6 }
 0x4b5   :  { %1137 = vmatpush1.bf16.msra.mxu0 %v2394_v29  ;;  %1872 = vmatpush3.bf16.msra.mxu1 %v2418_v40 }
 0x4b6   :  { %1138 = vmatprep.subr.bf16.mxu0 %v2398_v30  ;;  %1873 = vmatprep.subr.bf16.mxu1 %v2922_v6 }
 0x4b9   :  { %1139 = vmatpush1.bf16.msra.mxu0 %v2401_v32  ;;  %1874 = vmatpush3.bf16.msra.mxu1 %v2430_v43 }
 0x4ba   :  { %1140 = vmatprep.subr.bf16.mxu0 %v2404_v33  ;;  %1875 = vmatprep.subr.bf16.mxu1 %v2922_v6 }
 0x4bd   :  { %1141 = vmatpush1.bf16.msra.mxu0 %v2406_v34  ;;  %1876 = vmatpush3.bf16.msra.mxu1 %v2441_v47 }
 0x4be   :  { %1142 = vmatprep.subr.bf16.mxu0 %v2413_v38  ;;  %1877 = vmatprep.subr.bf16.mxu1 %v2922_v6 }
 0x4c1   :  { %1143 = vmatpush1.bf16.msra.mxu0 %v2424_v41  ;;  %1878 = vmatpush3.bf16.msra.mxu1 %v2453_v50 }
 0x4c2   :  { %1144 = vmatprep.subr.bf16.mxu0 %v2427_v42  ;;  %1879 = vmatprep.subr.bf16.mxu1 %v2922_v6 }
 0x4c5   :  { %1145 = vmatpush1.bf16.msra.mxu0 %v2434_v45  ;;  %1880 = vmatpush3.bf16.msra.mxu1 %v2462_v52 }
 0x4c6   :  { %1146 = vmatprep.subr.bf16.mxu0 %v2438_v46  ;;  %1881 = vmatprep.subr.bf16.mxu1 %v2922_v6 }
 0x4c9   :  { %1147 = vmatpush1.bf16.msra.mxu0 %v2447_v48  ;;  %1882 = vmatpush3.bf16.msra.mxu1 %v2468_v53 }
 0x4ca   :  { %1148 = vmatprep.subr.bf16.mxu0 %v2450_v49  ;;  %1883 = vmatprep.subr.bf16.mxu1 %v2922_v6 }
 0x4cd   :  { %1149 = vmatpush1.bf16.msra.mxu0 %v2457_v51  ;;  %1884 = vmatpush3.bf16.msra.mxu1 %v2476_v54 }
 0x4ce   :  { %1238 = vmatprep.subr.bf16.mxu0 %v2386_v24  ;;  %1889 = vmatprep.subr.bf16.mxu1 %v2922_v6 }
 0x583   :  { %v1064_v26 = vpop.f32.mrb[32].mxu0  ;;  %v1105_v27 = vpop.f32.mrb[24].mxu1 }
 0x584   :  { %v1065_v29 = vadd.f32 %v1064_v26, %v2578_v7  ;;  %v1066_v30 = vpop.f32.mrb[33].mxu0  ;;  %v1867_v32 = vpop.f32.mrb[25].mxu1  ;;  %v1106_v31 = vadd.f32 %v1105_v27, %v2586_v61 }
 0x585   :  { %v1067_v33 = vadd.f32 %v1066_v30, %v2580_v11  ;;  %v1068_v19 = vpop.f32.mrb[34].mxu0  ;;  %v1108_v39 = vpop.f32.mrb[26].mxu1 }
 0x586   :  { %v1111_v0 = vadd.f32 %v1065_v29, %v2547_v23  ;;  %v1069_v58 = vpop.f32.mrb[35].mxu0  ;;  %v1868_v4 = vpop.f32.mrb[27].mxu1  ;;  %v2925_v29 = vld [vmem:[#allocation18_spill] sm:$0xff] }
 0x587   :  { %v1118_v55 = vadd.f32 %v1067_v33, %v2549_v28  ;;  %v2125_v58 = vld [vmem:[#allocation7 + $0x8] ss:$12 sps:$4 sm:$0xff]   ;;  %v2126_v4 = vld [vmem:[#allocation7 + $0x20] ss:$12 sps:$4 sm:$0xff]  }
 0x588   :  { %v1635_v9 = vmul.f32 -1.442695, %v1111_v0 }
 0x589   :  { %v1636_v24 = vmul.f32 -1.442695, %v1118_v55  ;;  %v2127_v55 = vld [vmem:[#allocation7 + $0x38] ss:$12 sps:$4 sm:$0xff]  }
 0x58a   :  { %2078 = vpow2.f32 %v1635_v9  ;;  %v2129_v9 = vld [vmem:[#allocation7 + $0x50] ss:$12 sps:$4 sm:$0xff]  }
 0x58b   :  { %2080 = vpow2.f32 %v1636_v24  ;;  %v2130_v24 = vld [vmem:[#allocation7 + $0x64] ss:$12 sps:$4 sm:$0xff]  }
 0x594   :  { %v2079_v18 = vpop.eup %2078 }
 0x595   :  { %v2081_v12 = vpop.eup %2080  ;;  %v1115_v1 = vadd.f32 1.0, %v2079_v18  ;;  %v2131_v18 = vld [vmem:[#allocation7 + $0x60] ss:$12 sps:$4 sm:$0xff]  }
 0x596   :  { %v1122_v56 = vadd.f32 1.0, %v2081_v12  ;;  %v2132_v12 = vld [vmem:[#allocation7 + $0x68] ss:$12 sps:$4 sm:$0xff]  }
 0x597   :  { %2082 = vrcp.f32 %v1115_v1  ;;  %v2133_v1 = vld [vmem:[#allocation7 + $0x7c] ss:$12 sps:$4 sm:$0xff]  }
 0x598   :  { %2084 = vrcp.f32 %v1122_v56  ;;  %v2134_v56 = vld [vmem:[#allocation7 + $0x78] ss:$12 sps:$4 sm:$0xff]  }
 0x5a1   :  { %v2083_v35 = vpop.eup %2082 }
 0x5a2   :  { %v2085_v14 = vpop.eup %2084  ;;  %v1125_v20 = vmul.f32 %v2083_v35, %v1106_v31  ;;  %v2135_v31 = vld [vmem:[#allocation7 + $0x80] ss:$12 sps:$4 sm:$0xff]  }
 0x5a3   :  { %v1129_v23 = vsel %vm1128_vm5, %v2085_v14, 1.0  ;;  %v2136_v35 = vld [vmem:[#allocation7 + $0x94] ss:$12 sps:$4 sm:$0xff]   ;;  %v2137_v14 = vld [vmem:[#allocation7 + $0x90] ss:$12 sps:$4 sm:$0xff]  }
 0x5a4   :  { %v1126_v28 = vadd.f32 %v1125_v20, %v2559_v3  ;;  %v2796_v3 = vld [vmem:[#allocation7 + $0x18] ss:$12 sps:$4 sm:$0xff]  }
 0x5a5   :  { %v2138_v20 = vld [vmem:[#allocation7 + $0x98] ss:$12 sps:$4 sm:$0xff]  }
 0x5a6   :  { %2086 = vtanh.f32 %v1126_v28  ;;  %v2140_v28 = vld [vmem:[#allocation7 + $0xa8] ss:$12 sps:$4 sm:$0xff]  }
 0x5b0   :  { %v2087_v57 = vpop.eup %2086 }
 0x5b1   :  { %v1130_v2 = vsub.f32 %v2734_v63, %v2087_v57 }
 0x5b3   :  { %v1131_v5 = vmul.f32 %v1130_v2, %v1129_v23  ;;  %v2139_v23 = vld [vmem:[#allocation7 + $0xac] ss:$12 sps:$4 sm:$0xff]  }
 0x5b5   :  { %v2781_v44 = vadd.f32 %v2087_v57, %v1131_v5  ;;  %v2141_v57 = vld [vmem:[#allocation7 + $0xb0] ss:$12 sps:$4 sm:$0xff]  }
 0x5b7   :  { %v1133_v59 = vpack.c.bf16 %v2781_v44, %v2781_v44 }
 0x5b9   :  { %1167 = vmatmul.mubr.bf16.vlgmr.msra.gmra.mrb[36].mxu0 %v1133_v59  ;;  %1886 = vmatmul.mubr.bf16.vlgmr.msra.gmra.mrb[28].mxu1 %v1133_v59 }
 0x5ba   :  { %1239 = vmatpush1.bf16.msra.mxu0 %v2785_v60  ;;  %1890 = vmatpush3.bf16.msra.mxu1 %v2408_v36  ;;  %v2804_v36 = vld [vmem:[#allocation7 + $0x30] ss:$12 sps:$4 sm:$0xff]  }
 0x5bb   :  { %1240 = vmatprep.subr.bf16.mxu0 %v2789_v8  ;;  %1891 = vmatprep.subr.bf16.mxu1 %v2922_v6 }
 0x5bc   :  { %1270 = vmatprep.mubr.bf16.mxu0 %v2923_v16  ;;  %1905 = vmatprep.mubr.msk.bf16.mxu1 %vm2270_vm0, %v2922_v6 }
 0x5be   :  { %1241 = vmatpush1.bf16.msra.mxu0 %v2796_v3  ;;  %1892 = vmatpush3.bf16.msra.mxu1 %v2418_v40 }
 0x5bf   :  { %1242 = vmatprep.subr.bf16.mxu0 %v2800_v10  ;;  %1893 = vmatprep.subr.bf16.mxu1 %v2922_v6 }
 0x5c2   :  { %1243 = vmatpush1.bf16.msra.mxu0 %v2804_v36  ;;  %1894 = vmatpush3.bf16.msra.mxu1 %v2430_v43 }
 0x5c3   :  { %1244 = vmatprep.subr.bf16.mxu0 %v2808_v13  ;;  %1895 = vmatprep.subr.bf16.mxu1 %v2922_v6 }
 0x5c6   :  { %1245 = vmatpush1.bf16.msra.mxu0 %v2406_v34  ;;  %1896 = vmatpush3.bf16.msra.mxu1 %v2441_v47  ;;  %v2124_v34 = vld [vmem:[#allocation7 + $0x4] ss:$12 sps:$4 sm:$0xff]  }
 0x5c7   :  { %1246 = vmatprep.subr.bf16.mxu0 %v2413_v38  ;;  %1897 = vmatprep.subr.bf16.mxu1 %v2922_v6 }
 0x5ca   :  { %1247 = vmatpush1.bf16.msra.mxu0 %v2424_v41  ;;  %1898 = vmatpush3.bf16.msra.mxu1 %v2453_v50 }
 0x5cb   :  { %1248 = vmatprep.subr.bf16.mxu0 %v2427_v42  ;;  %1899 = vmatprep.subr.bf16.mxu1 %v2922_v6 }
 0x5ce   :  { %1249 = vmatpush1.bf16.msra.mxu0 %v2434_v45  ;;  %1900 = vmatpush3.bf16.msra.mxu1 %v2462_v52 }
 0x5cf   :  { %1250 = vmatprep.subr.bf16.mxu0 %v2438_v46  ;;  %1901 = vmatprep.subr.bf16.mxu1 %v2922_v6 }
 0x5d2   :  { %1251 = vmatpush1.bf16.msra.mxu0 %v2447_v48  ;;  %1902 = vmatpush3.bf16.msra.mxu1 %v2468_v53 }
 0x5d3   :  { %1252 = vmatprep.subr.bf16.mxu0 %v2450_v49  ;;  %1903 = vmatprep.subr.bf16.mxu1 %v2922_v6 }
 0x5d6   :  { %1253 = vmatpush1.bf16.msra.mxu0 %v2457_v51  ;;  %1904 = vmatpush3.bf16.msra.mxu1 %v2476_v54  ;;  %v2924_v51 = vld [vmem:[#allocation16_spill] sm:$0xff] }
 0x5d7   :  { %1342 = vmatprep.subr.bf16.mxu0 %v2124_v34  ;;  %1909 = vmatprep.subr.bf16.mxu1 %v2922_v6 }
 0x68c   :  { %v1168_v38 = vpop.f32.mrb[36].mxu0  ;;  %v1209_v40 = vpop.f32.mrb[28].mxu1 }
 0x68d   :  { %v1169_v41 = vadd.f32 %v1168_v38, %v2578_v7  ;;  %v1170_v42 = vpop.f32.mrb[37].mxu0  ;;  %v1887_v43 = vpop.f32.mrb[29].mxu1  ;;  %v1210_v63 = vadd.f32 %v1209_v40, %v2586_v61  ;;  %v2927_v40 = vld [vmem:[#allocation20_spill] sm:$0xff] }
 0x68e   :  { %v1171_v45 = vadd.f32 %v1170_v42, %v2580_v11  ;;  %v1172_v46 = vpop.f32.mrb[38].mxu0  ;;  %v1212_v47 = vpop.f32.mrb[30].mxu1 }
 0x68f   :  { %v1215_v48 = vadd.f32 %v1169_v41, %v2551_v37  ;;  %v1173_v49 = vpop.f32.mrb[39].mxu0  ;;  %v1888_v50 = vpop.f32.mrb[31].mxu1 }
 0x690   :  { %v1222_v52 = vadd.f32 %v1171_v45, %v2924_v51 }
 0x691   :  { %v1637_v53 = vmul.f32 -1.442695, %v1215_v48 }
 0x692   :  { %v1638_v54 = vmul.f32 -1.442695, %v1222_v52 }
 0x693   :  { %2088 = vpow2.f32 %v1637_v53 }
 0x694   :  { %2090 = vpow2.f32 %v1638_v54  ;;  %v2928_v54 = vld [vmem:[#allocation15_spill] sm:$0xff] }
 0x69d   :  { %v2089_v17 = vpop.eup %2088 }
 0x69e   :  { %v2091_v62 = vpop.eup %2090  ;;  %v1219_v21 = vadd.f32 1.0, %v2089_v17 }
 0x69f   :  { %v1226_v25 = vadd.f32 1.0, %v2091_v62 }
 0x6a0   :  { %2092 = vrcp.f32 %v1219_v21 }
 0x6a1   :  { %2094 = vrcp.f32 %v1226_v25 }
 0x6aa   :  { %v2093_v15 = vpop.eup %2092 }
 0x6ab   :  { %v2095_v26 = vpop.eup %2094  ;;  %v1229_v27 = vmul.f32 %v2093_v15, %v1210_v63 }
 0x6ac   :  { %v1233_v37 = vsel %vm1232_vm6, %v2095_v26, 1.0  ;;  %v2030_v26 = vld [vmem:[#allocation8] sm:$0xff]  }
 0x6ad   :  { %v1230_v30 = vadd.f32 %v1229_v27, %v2925_v29  ;;  %v2031_v27 = vld [vmem:[#allocation8 + $0x8] sm:$0xff]   ;;  %v2033_v29 = vld [vmem:[#allocation8 + $0x18] sm:$0xff]  }
 0x6af   :  { %2096 = vtanh.f32 %v1230_v30  ;;  %v2034_v30 = vld [vmem:[#allocation8 + $0x20] sm:$0xff]  }
 0x6b9   :  { %v2097_v32 = vpop.eup %2096 }
 0x6ba   :  { %v1234_v33 = vsub.f32 %v2781_v44, %v2097_v32 }
 0x6bc   :  { %v1235_v19 = vmul.f32 %v1234_v33, %v1233_v37  ;;  %v2032_v37 = vld [vmem:[#allocation8 + $0x10] sm:$0xff]  }
 0x6bd   :  { %v2036_v33 = vld [vmem:[#allocation8 + $0x30] sm:$0xff]  }
 0x6be   :  { %v2839_v39 = vadd.f32 %v2097_v32, %v1235_v19  ;;  %v2035_v32 = vld [vmem:[#allocation8 + $0x28] sm:$0xff]   ;;  %v2037_v19 = vld [vmem:[#allocation8 + $0x38] sm:$0xff]  }
 0x6c0   :  { %v1237_v0 = vpack.c.bf16 %v2839_v39, %v2839_v39 }
 0x6c2   :  { %1271 = vmatmul.mubr.bf16.vlgmr.msra.gmra.mrb[40].mxu0 %v1237_v0  ;;  %1906 = vmatmul.mubr.bf16.vlgmr.msra.gmra.mrb[32].mxu1 %v1237_v0 }
 0x6c3   :  { %1343 = vmatpush1.bf16.msra.mxu0 %v2785_v60  ;;  %1910 = vmatpush3.bf16.msra.mxu1 %v2125_v58 }
 0x6c4   :  { %1344 = vmatprep.subr.bf16.mxu0 %v2789_v8  ;;  %1911 = vmatprep.subr.bf16.mxu1 %v2922_v6 }
 0x6c5   :  { %1374 = vmatprep.mubr.bf16.mxu0 %v2923_v16  ;;  %1925 = vmatprep.mubr.msk.bf16.mxu1 %vm2270_vm0, %v2922_v6  ;;  %v2128_v16 = vld [vmem:[#allocation7 + $0x48] ss:$12 sps:$4 sm:$0xff]  }
 0x6c7   :  { %1345 = vmatpush1.bf16.msra.mxu0 %v2796_v3  ;;  %1912 = vmatpush3.bf16.msra.mxu1 %v2126_v4 }
 0x6c8   :  { %1346 = vmatprep.subr.bf16.mxu0 %v2800_v10  ;;  %1913 = vmatprep.subr.bf16.mxu1 %v2922_v6 }
 0x6cb   :  { %1347 = vmatpush1.bf16.msra.mxu0 %v2804_v36  ;;  %1914 = vmatpush3.bf16.msra.mxu1 %v2127_v55  ;;  %v2926_v36 = vld [vmem:[#allocation19_spill] sm:$0xff] }
 0x6cc   :  { %1348 = vmatprep.subr.bf16.mxu0 %v2808_v13  ;;  %1915 = vmatprep.subr.bf16.mxu1 %v2922_v6 }
 0x6cf   :  { %1349 = vmatpush1.bf16.msra.mxu0 %v2128_v16  ;;  %1916 = vmatpush3.bf16.msra.mxu1 %v2129_v9 }
 0x6d0   :  { %1350 = vmatprep.subr.bf16.mxu0 %v2130_v24  ;;  %1917 = vmatprep.subr.bf16.mxu1 %v2922_v6 }
 0x6d3   :  { %1351 = vmatpush1.bf16.msra.mxu0 %v2131_v18  ;;  %1918 = vmatpush3.bf16.msra.mxu1 %v2132_v12  ;;  %v2929_v18 = vld [vmem:[#allocation21_spill] sm:$0xff] }
 0x6d4   :  { %1352 = vmatprep.subr.bf16.mxu0 %v2133_v1  ;;  %1919 = vmatprep.subr.bf16.mxu1 %v2922_v6 }
 0x6d7   :  { %1353 = vmatpush1.bf16.msra.mxu0 %v2134_v56  ;;  %1920 = vmatpush3.bf16.msra.mxu1 %v2135_v31  ;;  %v2930_v31 = vld [vmem:[#allocation22_spill] sm:$0xff] }
 0x6d8   :  { %1354 = vmatprep.subr.bf16.mxu0 %v2136_v35  ;;  %1921 = vmatprep.subr.bf16.mxu1 %v2922_v6 }
 0x6db   :  { %1355 = vmatpush1.bf16.msra.mxu0 %v2137_v14  ;;  %1922 = vmatpush3.bf16.msra.mxu1 %v2138_v20 }
 0x6dc   :  { %1356 = vmatprep.subr.bf16.mxu0 %v2139_v23  ;;  %1923 = vmatprep.subr.bf16.mxu1 %v2922_v6 }
 0x6df   :  { %1357 = vmatpush1.bf16.msra.mxu0 %v2140_v28  ;;  %1924 = vmatpush3.bf16.msra.mxu1 %v2141_v57 }
 0x6e0   :  { %1929 = vmatprep.subr.bf16.mxu0 %v2922_v6 }
 0x795   :  { %v1272_v2 = vpop.f32.mrb[40].mxu0  ;;  %v1313_v5 = vpop.f32.mrb[32].mxu1 }
 0x796   :  { %v1273_v44 = vadd.f32 %v1272_v2, %v2578_v7  ;;  %v1274_v59 = vpop.f32.mrb[41].mxu0  ;;  %v1907_v60 = vpop.f32.mrb[33].mxu1  ;;  %v1314_v49 = vadd.f32 %v1313_v5, %v2586_v61 }
 0x797   :  { %v1275_v8 = vadd.f32 %v1274_v59, %v2580_v11  ;;  %v1276_v3 = vpop.f32.mrb[42].mxu0  ;;  %v1316_v10 = vpop.f32.mrb[34].mxu1  ;;  %v2931_v59 = vld [vmem:[#allocation17_spill] sm:$0xff] }
 0x798   :  { %v1319_v13 = vadd.f32 %v1273_v44, %v2926_v36  ;;  %v1277_v34 = vpop.f32.mrb[43].mxu0  ;;  %v1908_v38 = vpop.f32.mrb[35].mxu1 }
 0x799   :  { %v1326_v41 = vadd.f32 %v1275_v8, %v2927_v40  ;;  %v1643_v34 = vld [vmem:[%s2906_s7] ss:$0 sm:$0xff] }
 0x79a   :  { %v1639_v42 = vmul.f32 -1.442695, %v1319_v13 }
 0x79b   :  { %v1640_v43 = vmul.f32 -1.442695, %v1326_v41 }
 0x79c   :  { %2098 = vpow2.f32 %v1639_v42 }
 0x79d   :  { %2100 = vpow2.f32 %v1640_v43 }
 0x7a6   :  { %v2099_v45 = vpop.eup %2098 }
 0x7a7   :  { %v2101_v46 = vpop.eup %2100  ;;  %v1323_v47 = vadd.f32 1.0, %v2099_v45 }
 0x7a8   :  { %v1330_v48 = vadd.f32 1.0, %v2101_v46 }
 0x7a9   :  { %2102 = vrcp.f32 %v1323_v47 }
 0x7aa   :  { %2104 = vrcp.f32 %v1330_v48 }
 0x7b3   :  { %v2103_v50 = vpop.eup %2102 }
 0x7b4   :  { %v2105_v51 = vpop.eup %2104  ;;  %v1333_v52 = vmul.f32 %v2103_v50, %v1314_v49 }
 0x7b5   :  { %v1337_v53 = vsel %vm1336_vm7, %v2105_v51, 1.0 }
 0x7b6   :  { %v1334_v17 = vadd.f32 %v1333_v52, %v2928_v54 }
 0x7b8   :  { %2106 = vtanh.f32 %v1334_v17 }
 0x7c2   :  { %v2107_v62 = vpop.eup %2106 }
 0x7c3   :  { %v1338_v21 = vsub.f32 %v2839_v39, %v2107_v62 }
 0x7c5   :  { %v1339_v25 = vmul.f32 %v1338_v21, %v1337_v53 }
 0x7c7   :  { %v1340_v63 = vadd.f32 %v2107_v62, %v1339_v25 }
 0x7c9   :  { %v1341_v15 = vpack.c.bf16 %v1340_v63, %v1340_v63 }
 0x7cb   :  { %1375 = vmatmul.mubr.bf16.vlgmr.msra.gmra.mrb[44].mxu0 %v1341_v15  ;;  %1926 = vmatmul.mubr.bf16.vlgmr.msra.gmra.mrb[36].mxu1 %v1341_v15 }
 0x7cc   :  { %1945 = vmatprep.mubr.msk.bf16.mxu0 %vm2270_vm0, %v2922_v6  ;;  %1930 = vmatpush3.bf16.msra.mxu0 %v2030_v26 }
 0x7cd   :  { %1931 = vmatprep.subr.bf16.mxu0 %v2922_v6 }
 0x7d0   :  { %1932 = vmatpush3.bf16.msra.mxu0 %v2031_v27 }
 0x7d1   :  { %1933 = vmatprep.subr.bf16.mxu0 %v2922_v6 }
 0x7d4   :  { %1934 = vmatpush3.bf16.msra.mxu0 %v2032_v37 }
 0x7d5   :  { %1935 = vmatprep.subr.bf16.mxu0 %v2922_v6 }
 0x7d8   :  { %1936 = vmatpush3.bf16.msra.mxu0 %v2033_v29 }
 0x7d9   :  { %1937 = vmatprep.subr.bf16.mxu0 %v2922_v6 }
 0x7dc   :  { %1938 = vmatpush3.bf16.msra.mxu0 %v2034_v30 }
 0x7dd   :  { %1939 = vmatprep.subr.bf16.mxu0 %v2922_v6 }
 0x7e0   :  { %1940 = vmatpush3.bf16.msra.mxu0 %v2035_v32 }
 0x7e1   :  { %1941 = vmatprep.subr.bf16.mxu0 %v2922_v6 }
 0x7e4   :  { %1942 = vmatpush3.bf16.msra.mxu0 %v2036_v33 }
 0x7e5   :  { %1943 = vmatprep.subr.bf16.mxu0 %v2922_v6 }
 0x7e8   :  { %1944 = vmatpush3.bf16.msra.mxu0 %v2037_v19 }
 0x89e   :  { %v1376_v39 = vpop.f32.mrb[44].mxu0  ;;  %v1417_v0 = vpop.f32.mrb[36].mxu1 }
 0x89f   :  { %v1377_v58 = vadd.f32 %v1376_v39, %v2578_v7  ;;  %v1378_v4 = vpop.f32.mrb[45].mxu0  ;;  %v1927_v55 = vpop.f32.mrb[37].mxu1 }
 0x8a0   :  { %v1379_v16 = vadd.f32 %v1378_v4, %v2580_v11  ;;  %v1380_v9 = vpop.f32.mrb[46].mxu0  ;;  %v1420_v24 = vpop.f32.mrb[38].mxu1  ;;  %v1418_v11 = vadd.f32 %v1417_v0, %v2586_v61 }
 0x8a1   :  { %v1423_v12 = vadd.f32 %v1377_v58, %v2929_v18  ;;  %v1381_v1 = vpop.f32.mrb[47].mxu0  ;;  %v1928_v56 = vpop.f32.mrb[39].mxu1 }
 0x8a2   :  { %v1430_v35 = vadd.f32 %v1379_v16, %v2930_v31 }
 0x8a3   :  { %v1641_v14 = vmul.f32 -1.442695, %v1423_v12 }
 0x8a4   :  { %v1642_v20 = vmul.f32 -1.442695, %v1430_v35 }
 0x8a5   :  { %2108 = vpow2.f32 %v1641_v14 }
 0x8a6   :  { %2110 = vpow2.f32 %v1642_v20 }
 0x8af   :  { %v2109_v6 = vpop.eup %2108 }
 0x8b0   :  { %v2111_v23 = vpop.eup %2110  ;;  %v1427_v28 = vadd.f32 1.0, %v2109_v6 }
 0x8b1   :  { %v1434_v7 = vadd.f32 1.0, %v2111_v23 }
 0x8b2   :  { %2112 = vrcp.f32 %v1427_v28 }
 0x8b3   :  { %2114 = vrcp.f32 %v1434_v7 }
 0x8bc   :  { %v2113_v57 = vpop.eup %2112 }
 0x8bd   :  { %v2115_v2 = vpop.eup %2114  ;;  %v1437_v5 = vmul.f32 %v2113_v57, %v1418_v11 }
 0x8be   :  { %v1441_v44 = vsel %vm1440_vm8, %v2115_v2, 1.0 }
 0x8bf   :  { %v1438_v60 = vadd.f32 %v1437_v5, %v2931_v59 }
 0x8c1   :  { %2116 = vtanh.f32 %v1438_v60 }
 0x8cb   :  { %v2117_v8 = vpop.eup %2116 }
 0x8cc   :  { %v1442_v3 = vsub.f32 %v1340_v63, %v2117_v8 }
 0x8ce   :  { %v1443_v10 = vmul.f32 %v1442_v3, %v1441_v44 }
 0x8d0   :  { %v1444_v36 = vadd.f32 %v2117_v8, %v1443_v10 }
 0x8d2   :  { %v1445_v13 = vpack.c.bf16 %v1444_v36, %v1444_v36 }
 0x8d4   :  { %1946 = vmatmul.mubr.bf16.vlgmr.msra.gmra.mrb[48].mxu0 %v1445_v13 }
 0x9a7   :  { %v1551_v61 = vpop.f32.mrb[48].mxu0 }
 0x9a8   :  { %v1552_v38 = vadd.f32 %v1643_v34, %v1551_v61  ;;  %v1947_v40 = vpop.f32.mrb[49].mxu0 }
 0x9a9   :  { %v1554_v22 = vpop.f32.mrb[50].mxu0 }
 0x9aa   :  { %1557 = vst [vmem:[#allocation10] sm:$0xff] %v1552_v38  ;;  %v1948_v41 = vpop.f32.mrb[51].mxu0 }
 0x9ab   :  { %2241 = shalt.err (!%p2238_p8)
}
 0x9ac   :  { %s2242_s7 = scalar_lea.hbm %s2907_s8, 128 }
 0x9ad   :  { %p2243_p9 = scmp.ne.s32.totalorder %s2907_s8, %s2242_s7  ;;  %p2246_p10 = scmp.lt.u32.totalorder %s2242_s7, %s2907_s8 }
 0x9af   :  { %p2248_p11 = pnand %p2246_p10, %p2243_p9 }
 0x9b1   :  { %2251 = shalt.err (!%p2248_p11)
}
 0x9b2   :  { %1567 = dma.vmem_to_hbm [thread:$0]  %s1565_s14, 128, %s2907_s8, [#allocation4]  }
 0x9b3   :  { %2258 = dma.done.wait [#allocation4], 128  }
 0x9b4   :  { %2259 = vsyncadd [#allocation4], 4294967168 }
 0x9b5   :  { %1571 = vsyncpa [#allocation3], 1 }
 0x9b6   :  { %1572 = vsyncpa [#allocation6], 1 }
 0x9b7   :  { %1573 = vsyncpa [#allocation9], 1 }
 0x9b8   :  { %1574 = vsyncpa [#allocation4], 1 }

</bundles_post_ra>
